<compile_context>
chip_gen: v5e
topology: v5e:2x2
jax: 0.10.0
libtpu: 0.0.40
codegen_flags: <defaults>
</compile_context>

<pallas_src>
import functools

import jax
import jax.numpy as jnp
from jax import lax
from jax.experimental import pallas as pl
from jax.experimental.pallas import tpu as pltpu


def _round_up(x, m):
    return ((x + m - 1) // m) * m


_VMEM_LIMIT = 64 * 1024 * 1024  # explicit scoped-VMEM budget (fits v5e/v6e/v7x)


# ------------------------------------------------------------------ kernels

def _conv_matmul_kernel(x_ref, w_ref, b_ref, o_ref, acc_ref, *,
                        apply_lrelu, slope, apply_sigmoid):
    """Tiled im2col-matmul with f32 accumulator and fused bias/LeakyReLU/sigmoid epilogue."""
    @pl.when(pl.program_id(2) == 0)
    def _init():
        acc_ref[...] = jnp.zeros_like(acc_ref)

    acc_ref[...] += jnp.dot(x_ref[...], w_ref[...],
                            preferred_element_type=jnp.float32)

    @pl.when(pl.program_id(2) == pl.num_programs(2) - 1)
    def _finalize():
        acc = acc_ref[...] + b_ref[...]
        if apply_lrelu:
            acc = jnp.where(acc >= 0, acc, slope * acc)
        if apply_sigmoid:
            acc = jax.nn.sigmoid(acc)
        o_ref[...] = acc.astype(o_ref.dtype)


def _bn_stats_kernel(x_ref, sum_ref, sq_ref):
    """Per-channel sum / sum-of-squares reduction over a grid on M (accumulator outputs)."""
    @pl.when(pl.program_id(0) == 0)
    def _init():
        sum_ref[...] = jnp.zeros_like(sum_ref)
        sq_ref[...] = jnp.zeros_like(sq_ref)

    x = x_ref[...].astype(jnp.float32)
    sum_ref[...] += jnp.sum(x, axis=0, keepdims=True)
    sq_ref[...] += jnp.sum(x * x, axis=0, keepdims=True)


def _affine_lrelu_kernel(x_ref, a_ref, b_ref, o_ref, *, slope):
    """y = x*a + b followed by LeakyReLU, tiled over M."""
    y = x_ref[...].astype(jnp.float32) * a_ref[...] + b_ref[...]
    o_ref[...] = jnp.where(y >= 0, y, slope * y).astype(o_ref.dtype)


# ------------------------------------------------------------------ pallas wrappers

def _conv_matmul(patches, w_mat, bias, *, apply_lrelu, apply_sigmoid=False, slope=0.2):
    """(M, K) x (K, Cout) + bias [+LReLU][+sigmoid].  Lane-dense padded, bf16 MXU operands."""
    M, K = patches.shape
    _, Cout = w_mat.shape

    tm = min(512, _round_up(M, 16))     # bf16 sublane multiple
    tk = min(512, _round_up(K, 128))
    tn = 128
    Mp = _round_up(M, tm)
    Kp = _round_up(K, tk)
    Np = _round_up(Cout, tn)            # Cout=1 -> 128 lane-dense output

    x = jnp.pad(patches, ((0, Mp - M), (0, Kp - K))).astype(jnp.bfloat16)
    w = jnp.pad(w_mat, ((0, Kp - K), (0, Np - Cout))).astype(jnp.bfloat16)
    b = jnp.pad(bias, ((0, Np - Cout),)).astype(jnp.float32).reshape(1, Np)

    grid = (Mp // tm, Np // tn, Kp // tk)
    kernel = functools.partial(_conv_matmul_kernel, apply_lrelu=apply_lrelu,
                               slope=slope, apply_sigmoid=apply_sigmoid)

    out = pl.pallas_call(
        kernel,
        out_shape=jax.ShapeDtypeStruct((Mp, Np), jnp.float32),
        grid_spec=pltpu.PrefetchScalarGridSpec(
            num_scalar_prefetch=0,
            grid=grid,
            in_specs=[
                pl.BlockSpec((tm, tk), lambda i, j, k: (i, k)),
                pl.BlockSpec((tk, tn), lambda i, j, k: (k, j)),
                pl.BlockSpec((1, tn), lambda i, j, k: (0, j)),
            ],
            out_specs=pl.BlockSpec((tm, tn), lambda i, j, k: (i, j)),
            scratch_shapes=[pltpu.VMEM((tm, tn), jnp.float32)],
        ),
        compiler_params=pltpu.CompilerParams(
            dimension_semantics=("parallel", "parallel", "arbitrary"),
            vmem_limit_bytes=_VMEM_LIMIT,
        ),
        cost_estimate=pl.CostEstimate(
            flops=2 * Mp * Kp * Np,
            transcendentals=0,
            bytes_accessed=Mp * Kp * 2 + Kp * Np * 2 + Mp * Np * 4,
        ),
    )(x, w, b)
    return out[:M, :Cout]


def _bn_lrelu(x_mc, gamma, beta, *, eps=1e-5, slope=0.2):
    """BatchNorm (batch stats over axis 0, biased variance) + LeakyReLU on (M, C)."""
    M, C = x_mc.shape
    tm = min(512, _round_up(M, 8))
    Cp = _round_up(C, 128)
    Mp = _round_up(M, tm)

    xp = jnp.pad(x_mc, ((0, Mp - M), (0, Cp - C)))
    g = jnp.pad(gamma, ((0, Cp - C),)).reshape(1, Cp)
    bt = jnp.pad(beta, ((0, Cp - C),)).reshape(1, Cp)
    grid = (Mp // tm,)

    # pass 1: per-channel sum / sumsq (zero-padded rows/cols contribute nothing)
    s, sq = pl.pallas_call(
        _bn_stats_kernel,
        out_shape=(jax.ShapeDtypeStruct((1, Cp), jnp.float32),
                   jax.ShapeDtypeStruct((1, Cp), jnp.float32)),
        grid_spec=pltpu.PrefetchScalarGridSpec(
            num_scalar_prefetch=0,
            grid=grid,
            in_specs=[pl.BlockSpec((tm, Cp), lambda i: (i, 0))],
            out_specs=(pl.BlockSpec((1, Cp), lambda i: (0, 0)),
                       pl.BlockSpec((1, Cp), lambda i: (0, 0))),
        ),
        compiler_params=pltpu.CompilerParams(
            dimension_semantics=("arbitrary",),
            vmem_limit_bytes=_VMEM_LIMIT,
        ),
    )(xp)

    # tiny (1, C) finalization; clamp var >= 0 against cancellation
    mean = s / M
    var = jnp.maximum(sq / M - mean * mean, 0.0)
    inv = lax.rsqrt(var + eps)
    scale = g * inv
    shift = bt - mean * scale

    # pass 2: affine + LeakyReLU, tiled over M
    y = pl.pallas_call(
        functools.partial(_affine_lrelu_kernel, slope=slope),
        out_shape=jax.ShapeDtypeStruct((Mp, Cp), jnp.float32),
        grid_spec=pltpu.PrefetchScalarGridSpec(
            num_scalar_prefetch=0,
            grid=grid,
            in_specs=[pl.BlockSpec((tm, Cp), lambda i: (i, 0)),
                      pl.BlockSpec((1, Cp), lambda i: (0, 0)),
                      pl.BlockSpec((1, Cp), lambda i: (0, 0))],
            out_specs=pl.BlockSpec((tm, Cp), lambda i: (i, 0)),
        ),
        compiler_params=pltpu.CompilerParams(
            dimension_semantics=("parallel",),
            vmem_limit_bytes=_VMEM_LIMIT,
        ),
    )(xp, scale, shift)
    return y[:M, :C]


# ------------------------------------------------------------------ glue (channels-last)

def _im2col_nhwc(x_nhwc, k, stride, pad):
    """Extract kxk patches from NHWC. Returns (N*Ho*Wo, kh*kw*C) with (kh, kw, C) inner
    order (matched by the weight reordering in conv2d_nhwc). Strides are Python ints."""
    # TODO(synk): replace HBM-materialized im2col with in-kernel manual-DMA patch gather
    # (memory_space=pl.ANY + row-strip double buffering) to avoid the kh*kw activation blowup.
    x = jnp.pad(x_nhwc, ((0, 0), (pad, pad), (pad, pad), (0, 0)))
    N, H, W, C = x.shape
    Ho = (H - k) // stride + 1
    Wo = (W - k) // stride + 1
    cols = []
    for i in range(k):
        for j in range(k):
            cols.append(x[:, i:i + stride * Ho:stride, j:j + stride * Wo:stride, :])
    p = jnp.stack(cols, axis=3).reshape(N * Ho * Wo, k * k * C)
    return p, Ho, Wo


def conv2d_nhwc(x_nhwc, weight, bias, stride, pad, *, apply_lrelu, apply_sigmoid=False):
    """weight: (Cout, Cin, kh, kw) as in PyTorch; bias: (Cout,). NHWC in, NHWC out."""
    Cout, Cin, kh, kw = weight.shape
    N = x_nhwc.shape[0]
    patches, Ho, Wo = _im2col_nhwc(x_nhwc, kh, stride, pad)
    # reorder weight to (kh, kw, Cin, Cout) -> (kh*kw*Cin, Cout) to match patch K-order
    w_mat = weight.transpose(2, 3, 1, 0).reshape(kh * kw * Cin, Cout)
    out = _conv_matmul(patches, w_mat, bias,
                       apply_lrelu=apply_lrelu, apply_sigmoid=apply_sigmoid)
    return out.reshape(N, Ho, Wo, Cout)


def batchnorm_lrelu_nhwc(x_nhwc, gamma, beta):
    N, H, W, C = x_nhwc.shape
    y = _bn_lrelu(x_nhwc.reshape(N * H * W, C), gamma, beta)
    return y.reshape(N, H, W, C)


# ------------------------------------------------------------------ model

def init_nlayer_discriminator(key, input_nc, ndf=64, n_layers=3):
    """Synthetic params; conv weights ~ N(0, 0.02), biases 0, BN gamma=1, beta=0.
    Params hold ONLY arrays; strides / BN-presence are derived statically in forward."""
    kw_ = 4
    keys = jax.random.split(key, n_layers + 2)

    def conv_w(k, cout, cin):
        return 0.02 * jax.random.normal(k, (cout, cin, kw_, kw_), jnp.float32)

    params = []
    # layer 0: conv (bias) + lrelu
    params.append(dict(w=conv_w(keys[0], ndf, input_nc),
                       b=jnp.zeros((ndf,), jnp.float32)))
    nf_mult = 1
    for n in range(1, n_layers):
        nf_prev, nf_mult = nf_mult, min(2 ** n, 8)
        c = ndf * nf_mult
        params.append(dict(w=conv_w(keys[n], c, ndf * nf_prev),
                           b=jnp.zeros((c,), jnp.float32),       # use_bias=False -> zero
                           gamma=jnp.ones((c,), jnp.float32),
                           beta=jnp.zeros((c,), jnp.float32)))
    nf_prev, nf_mult = nf_mult, min(2 ** n_layers, 8)
    c = ndf * nf_mult
    params.append(dict(w=conv_w(keys[n_layers], c, ndf * nf_prev),
                       b=jnp.zeros((c,), jnp.float32),
                       gamma=jnp.ones((c,), jnp.float32),
                       beta=jnp.zeros((c,), jnp.float32)))
    # final conv -> 1 channel (bias), no activation (optional sigmoid)
    params.append(dict(w=conv_w(keys[n_layers + 1], 1, c),
                       b=jnp.zeros((1,), jnp.float32)))
    return params


def nlayer_discriminator_forward(params, x_nchw, *, use_sigmoid=False):
    n_total = len(params)          # static (pytree structure)
    n_layers = n_total - 2
    h = jnp.transpose(x_nchw, (0, 2, 3, 1))   # NCHW -> NHWC once at entry
    for i, p in enumerate(params):
        is_last = (i == n_total - 1)
        stride = 2 if i < n_layers else 1     # static Python int (bug fix)
        if "gamma" in p:
            h = conv2d_nhwc(h, p["w"], p["b"], stride, 1, apply_lrelu=False)
            h = batchnorm_lrelu_nhwc(h, p["gamma"], p["beta"])
        else:
            h = conv2d_nhwc(h, p["w"], p["b"], stride, 1,
                            apply_lrelu=not is_last,
                            apply_sigmoid=(is_last and use_sigmoid))
    return jnp.transpose(h, (0, 3, 1, 2))     # NHWC -> NCHW at exit


# ------------------------------------------------------------------ main

if __name__ == "__main__":
    key = jax.random.PRNGKey(0)
    k_param, k_x = jax.random.split(key)

    # Spatial must survive 3x stride-2 convs plus two k=4 s=1 p=1 convs -> 32x32.
    N, input_nc, H, W = 2, 4, 32, 32
    ndf, n_layers = 8, 3

    params = init_nlayer_discriminator(k_param, input_nc, ndf=ndf, n_layers=n_layers)
    x = jax.random.normal(k_x, (N, input_nc, H, W), jnp.float32)

    fwd = jax.jit(functools.partial(nlayer_discriminator_forward, use_sigmoid=False))
    out = fwd(params, x)
    jax.block_until_ready(out)

    assert out.shape == (N, 1, 2, 2), out.shape
    assert bool(jnp.all(jnp.isfinite(out)))
    print("KERNEL_OK")
</pallas_src>

<mosaic_0001>
module attributes {stable_mosaic.version = 11 : i64} {
  func.func @_conv_matmul_kernel(%arg0: i32, %arg1: i32, %arg2: i32, %arg3: memref<512x128xbf16, #tpu.memory_space<vmem>>, %arg4: memref<128x128xbf16, #tpu.memory_space<vmem>>, %arg5: memref<1x128xf32, #tpu.memory_space<vmem>>, %arg6: memref<512x128xf32, #tpu.memory_space<vmem>>, %arg7: memref<512x128xf32, #tpu.memory_space<vmem>>) attributes {dimension_semantics = [#tpu.dimension_semantics<parallel>, #tpu.dimension_semantics<parallel>, #tpu.dimension_semantics<arbitrary>], iteration_bounds = array<i64: 1, 1, 1>, scalar_prefetch = 0 : i64, scratch_operands = 1 : i64, tpu.core_type = #tpu.core_type<tc>, window_params = [{transform_indices = @transform_0, window_bounds = array<i64: 512, 128>}, {transform_indices = @transform_1, window_bounds = array<i64: 128, 128>}, {transform_indices = @transform_2, window_bounds = array<i64: 1, 128>}, {transform_indices = @transform_3, window_bounds = array<i64: 512, 128>}]} {
    %c0_i32 = arith.constant 0 : i32
    %0 = arith.cmpi eq, %arg2, %c0_i32 : i32
    %1 = arith.extui %0 : i1 to i32
    %c0_i32_0 = arith.constant 0 : i32
    %2 = arith.cmpi ne, %1, %c0_i32_0 : i32
    scf.if %2 {
      %cst_10 = arith.constant 0.000000e+00 : f32
      %12 = vector.broadcast %cst_10 : f32 to vector<512x128xf32>
      %c0_11 = arith.constant 0 : index
      %c0_12 = arith.constant 0 : index
      %13 = vector.load %arg7[%c0_11, %c0_12] : memref<512x128xf32, #tpu.memory_space<vmem>>, vector<512x128xf32>
      tpu.vector_store %arg7[%c0_11, %c0_12], %12 {strides = array<i32>} : memref<512x128xf32, #tpu.memory_space<vmem>>, vector<512x128xf32>,
    } else {
    }
    %c0 = arith.constant 0 : index
    %c0_1 = arith.constant 0 : index
    %3 = vector.load %arg7[%c0, %c0_1] : memref<512x128xf32, #tpu.memory_space<vmem>>, vector<512x128xf32>
    %c0_2 = arith.constant 0 : index
    %c0_3 = arith.constant 0 : index
    %4 = vector.load %arg3[%c0_2, %c0_3] : memref<512x128xbf16, #tpu.memory_space<vmem>>, vector<512x128xbf16>
    %c0_4 = arith.constant 0 : index
    %c0_5 = arith.constant 0 : index
    %5 = vector.load %arg4[%c0_4, %c0_5] : memref<128x128xbf16, #tpu.memory_space<vmem>>, vector<128x128xbf16>
    %cst = arith.constant dense<0.000000e+00> : vector<512x128xf32>
    %6 = tpu.matmul %4, %5, %cst {dimension_numbers = #tpu.dot_dimension_numbers<[1], [0], [0], [1], [0, 0, 1, 1], [], []>} : vector<512x128xbf16>, vector<128x128xbf16>, vector<512x128xf32> -> vector<512x128xf32>
    %7 = arith.addf %3, %6 : vector<512x128xf32>
    %c0_6 = arith.constant 0 : index
    %c0_7 = arith.constant 0 : index
    %8 = vector.load %arg7[%c0_6, %c0_7] : memref<512x128xf32, #tpu.memory_space<vmem>>, vector<512x128xf32>
    tpu.vector_store %arg7[%c0_6, %c0_7], %7 {strides = array<i32>} : memref<512x128xf32, #tpu.memory_space<vmem>>, vector<512x128xf32>,
    %c0_i32_8 = arith.constant 0 : i32
    %9 = arith.cmpi eq, %arg2, %c0_i32_8 : i32
    %10 = arith.extui %9 : i1 to i32
    %c0_i32_9 = arith.constant 0 : i32
    %11 = arith.cmpi ne, %10, %c0_i32_9 : i32
    scf.if %11 {
      %c0_10 = arith.constant 0 : index
      %c0_11 = arith.constant 0 : index
      %12 = vector.load %arg7[%c0_10, %c0_11] : memref<512x128xf32, #tpu.memory_space<vmem>>, vector<512x128xf32>
      %c0_12 = arith.constant 0 : index
      %c0_13 = arith.constant 0 : index
      %13 = vector.load %arg5[%c0_12, %c0_13] : memref<1x128xf32, #tpu.memory_space<vmem>>, vector<1x128xf32>
      %14 = vector.broadcast %13 : vector<1x128xf32> to vector<512x128xf32>
      %15 = arith.addf %12, %14 : vector<512x128xf32>
      %cst_14 = arith.constant 0.000000e+00 : f32
      %16 = vector.broadcast %cst_14 : f32 to vector<512x128xf32>
      %17 = arith.cmpf oge, %15, %16 : vector<512x128xf32>
      %cst_15 = arith.constant 2.000000e-01 : f32
      %18 = vector.broadcast %cst_15 : f32 to vector<512x128xf32>
      %19 = arith.mulf %18, %15 : vector<512x128xf32>
      %20 = arith.select %17, %15, %19 : vector<512x128xi1>, vector<512x128xf32>
      %c0_16 = arith.constant 0 : index
      %c0_17 = arith.constant 0 : index
      %21 = vector.load %arg6[%c0_16, %c0_17] : memref<512x128xf32, #tpu.memory_space<vmem>>, vector<512x128xf32>
      tpu.vector_store %arg6[%c0_16, %c0_17], %20 {strides = array<i32>} : memref<512x128xf32, #tpu.memory_space<vmem>>, vector<512x128xf32>,
    } else {
    }
    return
  }
  func.func @transform_0(%arg0: i32, %arg1: i32, %arg2: i32) -> (i32, i32) {
    %c0_i32 = arith.constant 0 : i32
    return %arg0, %arg2 : i32, i32
  }
  func.func @transform_1(%arg0: i32, %arg1: i32, %arg2: i32) -> (i32, i32) {
    %c0_i32 = arith.constant 0 : i32
    return %arg2, %arg1 : i32, i32
  }
  func.func @transform_2(%arg0: i32, %arg1: i32, %arg2: i32) -> (i32, i32) {
    %c0_i32 = arith.constant 0 : i32
    %c0_i32_0 = arith.constant 0 : i32
    return %c0_i32, %arg1 : i32, i32
  }
  func.func @transform_3(%arg0: i32, %arg1: i32, %arg2: i32) -> (i32, i32) {
    %c0_i32 = arith.constant 0 : i32
    return %arg0, %arg1 : i32, i32
  }
}

module attributes {stable_mosaic.version = 11 : i64} {
  func.func @_conv_matmul_kernel(%arg0: i32, %arg1: i32, %arg2: i32, %arg3: memref<128x128xbf16, #tpu.memory_space<vmem>>, %arg4: memref<128x128xbf16, #tpu.memory_space<vmem>>, %arg5: memref<1x128xf32, #tpu.memory_space<vmem>>, %arg6: memref<128x128xf32, #tpu.memory_space<vmem>>, %arg7: memref<128x128xf32, #tpu.memory_space<vmem>>) attributes {dimension_semantics = [#tpu.dimension_semantics<parallel>, #tpu.dimension_semantics<parallel>, #tpu.dimension_semantics<arbitrary>], iteration_bounds = array<i64: 1, 1, 1>, scalar_prefetch = 0 : i64, scratch_operands = 1 : i64, tpu.core_type = #tpu.core_type<tc>, window_params = [{transform_indices = @transform_0, window_bounds = array<i64: 128, 128>}, {transform_indices = @transform_1, window_bounds = array<i64: 128, 128>}, {transform_indices = @transform_2, window_bounds = array<i64: 1, 128>}, {transform_indices = @transform_3, window_bounds = array<i64: 128, 128>}]} {
    %c0_i32 = arith.constant 0 : i32
    %0 = arith.cmpi eq, %arg2, %c0_i32 : i32
    %1 = arith.extui %0 : i1 to i32
    %c0_i32_0 = arith.constant 0 : i32
    %2 = arith.cmpi ne, %1, %c0_i32_0 : i32
    scf.if %2 {
      %cst_10 = arith.constant 0.000000e+00 : f32
      %12 = vector.broadcast %cst_10 : f32 to vector<128x128xf32>
      %c0_11 = arith.constant 0 : index
      %c0_12 = arith.constant 0 : index
      %13 = vector.load %arg7[%c0_11, %c0_12] : memref<128x128xf32, #tpu.memory_space<vmem>>, vector<128x128xf32>
      tpu.vector_store %arg7[%c0_11, %c0_12], %12 {strides = array<i32>} : memref<128x128xf32, #tpu.memory_space<vmem>>, vector<128x128xf32>,
    } else {
    }
    %c0 = arith.constant 0 : index
    %c0_1 = arith.constant 0 : index
    %3 = vector.load %arg7[%c0, %c0_1] : memref<128x128xf32, #tpu.memory_space<vmem>>, vector<128x128xf32>
    %c0_2 = arith.constant 0 : index
    %c0_3 = arith.constant 0 : index
    %4 = vector.load %arg3[%c0_2, %c0_3] : memref<128x128xbf16, #tpu.memory_space<vmem>>, vector<128x128xbf16>
    %c0_4 = arith.constant 0 : index
    %c0_5 = arith.constant 0 : index
    %5 = vector.load %arg4[%c0_4, %c0_5] : memref<128x128xbf16, #tpu.memory_space<vmem>>, vector<128x128xbf16>
    %cst = arith.constant dense<0.000000e+00> : vector<128x128xf32>
    %6 = tpu.matmul %4, %5, %cst {dimension_numbers = #tpu.dot_dimension_numbers<[1], [0], [0], [1], [0, 0, 1, 1], [], []>} : vector<128x128xbf16>, vector<128x128xbf16>, vector<128x128xf32> -> vector<128x128xf32>
    %7 = arith.addf %3, %6 : vector<128x128xf32>
    %c0_6 = arith.constant 0 : index
    %c0_7 = arith.constant 0 : index
    %8 = vector.load %arg7[%c0_6, %c0_7] : memref<128x128xf32, #tpu.memory_space<vmem>>, vector<128x128xf32>
    tpu.vector_store %arg7[%c0_6, %c0_7], %7 {strides = array<i32>} : memref<128x128xf32, #tpu.memory_space<vmem>>, vector<128x128xf32>,
    %c0_i32_8 = arith.constant 0 : i32
    %9 = arith.cmpi eq, %arg2, %c0_i32_8 : i32
    %10 = arith.extui %9 : i1 to i32
    %c0_i32_9 = arith.constant 0 : i32
    %11 = arith.cmpi ne, %10, %c0_i32_9 : i32
    scf.if %11 {
      %c0_10 = arith.constant 0 : index
      %c0_11 = arith.constant 0 : index
      %12 = vector.load %arg7[%c0_10, %c0_11] : memref<128x128xf32, #tpu.memory_space<vmem>>, vector<128x128xf32>
      %c0_12 = arith.constant 0 : index
      %c0_13 = arith.constant 0 : index
      %13 = vector.load %arg5[%c0_12, %c0_13] : memref<1x128xf32, #tpu.memory_space<vmem>>, vector<1x128xf32>
      %14 = vector.broadcast %13 : vector<1x128xf32> to vector<128x128xf32>
      %15 = arith.addf %12, %14 : vector<128x128xf32>
      %c0_14 = arith.constant 0 : index
      %c0_15 = arith.constant 0 : index
      %16 = vector.load %arg6[%c0_14, %c0_15] : memref<128x128xf32, #tpu.memory_space<vmem>>, vector<128x128xf32>
      tpu.vector_store %arg6[%c0_14, %c0_15], %15 {strides = array<i32>} : memref<128x128xf32, #tpu.memory_space<vmem>>, vector<128x128xf32>,
    } else {
    }
    return
  }
  func.func @transform_0(%arg0: i32, %arg1: i32, %arg2: i32) -> (i32, i32) {
    %c0_i32 = arith.constant 0 : i32
    return %arg0, %arg2 : i32, i32
  }
  func.func @transform_1(%arg0: i32, %arg1: i32, %arg2: i32) -> (i32, i32) {
    %c0_i32 = arith.constant 0 : i32
    return %arg2, %arg1 : i32, i32
  }
  func.func @transform_2(%arg0: i32, %arg1: i32, %arg2: i32) -> (i32, i32) {
    %c0_i32 = arith.constant 0 : i32
    %c0_i32_0 = arith.constant 0 : i32
    return %c0_i32, %arg1 : i32, i32
  }
  func.func @transform_3(%arg0: i32, %arg1: i32, %arg2: i32) -> (i32, i32) {
    %c0_i32 = arith.constant 0 : i32
    return %arg0, %arg1 : i32, i32
  }
}

module attributes {stable_mosaic.version = 11 : i64} {
  func.func @_bn_stats_kernel(%arg0: i32, %arg1: memref<128x128xf32, #tpu.memory_space<vmem>>, %arg2: memref<1x128xf32, #tpu.memory_space<vmem>>, %arg3: memref<1x128xf32, #tpu.memory_space<vmem>>) attributes {dimension_semantics = [#tpu.dimension_semantics<arbitrary>], iteration_bounds = array<i64: 1>, scalar_prefetch = 0 : i64, scratch_operands = 0 : i64, tpu.core_type = #tpu.core_type<tc>, window_params = [{transform_indices = @transform_0, window_bounds = array<i64: 128, 128>}, {pipeline_mode = #tpu.pipeline_mode<synchronous>, transform_indices = @transform_1, window_bounds = array<i64: 1, 128>}, {pipeline_mode = #tpu.pipeline_mode<synchronous>, transform_indices = @transform_2, window_bounds = array<i64: 1, 128>}]} {
    %c0_i32 = arith.constant 0 : i32
    %0 = arith.cmpi eq, %arg0, %c0_i32 : i32
    %1 = arith.extui %0 : i1 to i32
    %c0_i32_0 = arith.constant 0 : i32
    %2 = arith.cmpi ne, %1, %c0_i32_0 : i32
    scf.if %2 {
      %cst_11 = arith.constant 0.000000e+00 : f32
      %15 = vector.broadcast %cst_11 : f32 to vector<1x128xf32>
      %c0_12 = arith.constant 0 : index
      %c0_13 = arith.constant 0 : index
      %16 = vector.load %arg2[%c0_12, %c0_13] : memref<1x128xf32, #tpu.memory_space<vmem>>, vector<1x128xf32>
      tpu.vector_store %arg2[%c0_12, %c0_13], %15 {strides = array<i32>} : memref<1x128xf32, #tpu.memory_space<vmem>>, vector<1x128xf32>,
      %cst_14 = arith.constant 0.000000e+00 : f32
      %17 = vector.broadcast %cst_14 : f32 to vector<1x128xf32>
      %c0_15 = arith.constant 0 : index
      %c0_16 = arith.constant 0 : index
      %18 = vector.load %arg3[%c0_15, %c0_16] : memref<1x128xf32, #tpu.memory_space<vmem>>, vector<1x128xf32>
      tpu.vector_store %arg3[%c0_15, %c0_16], %17 {strides = array<i32>} : memref<1x128xf32, #tpu.memory_space<vmem>>, vector<1x128xf32>,
    } else {
    }
    %c0 = arith.constant 0 : index
    %c0_1 = arith.constant 0 : index
    %3 = vector.load %arg1[%c0, %c0_1] : memref<128x128xf32, #tpu.memory_space<vmem>>, vector<128x128xf32>
    %c0_2 = arith.constant 0 : index
    %c0_3 = arith.constant 0 : index
    %4 = vector.load %arg2[%c0_2, %c0_3] : memref<1x128xf32, #tpu.memory_space<vmem>>, vector<1x128xf32>
    %cst = arith.constant dense<0.000000e+00> : vector<128xf32>
    %5 = vector.multi_reduction <add>, %3, %cst [0] : vector<128x128xf32> to vector<128xf32>
    %6 = vector.shape_cast %5 : vector<128xf32> to vector<1x128xf32>
    %7 = arith.addf %4, %6 : vector<1x128xf32>
    %c0_4 = arith.constant 0 : index
    %c0_5 = arith.constant 0 : index
    %8 = vector.load %arg2[%c0_4, %c0_5] : memref<1x128xf32, #tpu.memory_space<vmem>>, vector<1x128xf32>
    tpu.vector_store %arg2[%c0_4, %c0_5], %7 {strides = array<i32>} : memref<1x128xf32, #tpu.memory_space<vmem>>, vector<1x128xf32>,
    %c0_6 = arith.constant 0 : index
    %c0_7 = arith.constant 0 : index
    %9 = vector.load %arg3[%c0_6, %c0_7] : memref<1x128xf32, #tpu.memory_space<vmem>>, vector<1x128xf32>
    %10 = arith.mulf %3, %3 : vector<128x128xf32>
    %cst_8 = arith.constant dense<0.000000e+00> : vector<128xf32>
    %11 = vector.multi_reduction <add>, %10, %cst_8 [0] : vector<128x128xf32> to vector<128xf32>
    %12 = vector.shape_cast %11 : vector<128xf32> to vector<1x128xf32>
    %13 = arith.addf %9, %12 : vector<1x128xf32>
    %c0_9 = arith.constant 0 : index
    %c0_10 = arith.constant 0 : index
    %14 = vector.load %arg3[%c0_9, %c0_10] : memref<1x128xf32, #tpu.memory_space<vmem>>, vector<1x128xf32>
    tpu.vector_store %arg3[%c0_9, %c0_10], %13 {strides = array<i32>} : memref<1x128xf32, #tpu.memory_space<vmem>>, vector<1x128xf32>,
    return
  }
  func.func @transform_0(%arg0: i32) -> (i32, i32) {
    %c0_i32 = arith.constant 0 : i32
    %c0_i32_0 = arith.constant 0 : i32
    return %arg0, %c0_i32 : i32, i32
  }
  func.func @transform_1(%arg0: i32) -> (i32, i32) {
    %c0_i32 = arith.constant 0 : i32
    %c0_i32_0 = arith.constant 0 : i32
    %c0_i32_1 = arith.constant 0 : i32
    return %c0_i32, %c0_i32_0 : i32, i32
  }
  func.func @transform_2(%arg0: i32) -> (i32, i32) {
    %c0_i32 = arith.constant 0 : i32
    %c0_i32_0 = arith.constant 0 : i32
    %c0_i32_1 = arith.constant 0 : i32
    return %c0_i32, %c0_i32_0 : i32, i32
  }
}

module attributes {stable_mosaic.version = 11 : i64} {
  func.func @_affine_lrelu_kernel(%arg0: i32, %arg1: memref<128x128xf32, #tpu.memory_space<vmem>>, %arg2: memref<1x128xf32, #tpu.memory_space<vmem>>, %arg3: memref<1x128xf32, #tpu.memory_space<vmem>>, %arg4: memref<128x128xf32, #tpu.memory_space<vmem>>) attributes {dimension_semantics = [#tpu.dimension_semantics<parallel>], iteration_bounds = array<i64: 1>, scalar_prefetch = 0 : i64, scratch_operands = 0 : i64, tpu.core_type = #tpu.core_type<tc>, window_params = [{transform_indices = @transform_0, window_bounds = array<i64: 128, 128>}, {pipeline_mode = #tpu.pipeline_mode<synchronous>, transform_indices = @transform_1, window_bounds = array<i64: 1, 128>}, {pipeline_mode = #tpu.pipeline_mode<synchronous>, transform_indices = @transform_2, window_bounds = array<i64: 1, 128>}, {transform_indices = @transform_3, window_bounds = array<i64: 128, 128>}]} {
    %c0 = arith.constant 0 : index
    %c0_0 = arith.constant 0 : index
    %0 = vector.load %arg1[%c0, %c0_0] : memref<128x128xf32, #tpu.memory_space<vmem>>, vector<128x128xf32>
    %c0_1 = arith.constant 0 : index
    %c0_2 = arith.constant 0 : index
    %1 = vector.load %arg2[%c0_1, %c0_2] : memref<1x128xf32, #tpu.memory_space<vmem>>, vector<1x128xf32>
    %2 = vector.broadcast %1 : vector<1x128xf32> to vector<128x128xf32>
    %3 = arith.mulf %0, %2 : vector<128x128xf32>
    %c0_3 = arith.constant 0 : index
    %c0_4 = arith.constant 0 : index
    %4 = vector.load %arg3[%c0_3, %c0_4] : memref<1x128xf32, #tpu.memory_space<vmem>>, vector<1x128xf32>
    %5 = vector.broadcast %4 : vector<1x128xf32> to vector<128x128xf32>
    %6 = arith.addf %3, %5 : vector<128x128xf32>
    %cst = arith.constant 0.000000e+00 : f32
    %7 = vector.broadcast %cst : f32 to vector<128x128xf32>
    %8 = arith.cmpf oge, %6, %7 : vector<128x128xf32>
    %cst_5 = arith.constant 2.000000e-01 : f32
    %9 = vector.broadcast %cst_5 : f32 to vector<128x128xf32>
    %10 = arith.mulf %9, %6 : vector<128x128xf32>
    %11 = arith.select %8, %6, %10 : vector<128x128xi1>, vector<128x128xf32>
    %c0_6 = arith.constant 0 : index
    %c0_7 = arith.constant 0 : index
    %12 = vector.load %arg4[%c0_6, %c0_7] : memref<128x128xf32, #tpu.memory_space<vmem>>, vector<128x128xf32>
    tpu.vector_store %arg4[%c0_6, %c0_7], %11 {strides = array<i32>} : memref<128x128xf32, #tpu.memory_space<vmem>>, vector<128x128xf32>,
    return
  }
  func.func @transform_0(%arg0: i32) -> (i32, i32) {
    %c0_i32 = arith.constant 0 : i32
    %c0_i32_0 = arith.constant 0 : i32
    return %arg0, %c0_i32 : i32, i32
  }
  func.func @transform_1(%arg0: i32) -> (i32, i32) {
    %c0_i32 = arith.constant 0 : i32
    %c0_i32_0 = arith.constant 0 : i32
    %c0_i32_1 = arith.constant 0 : i32
    return %c0_i32, %c0_i32_0 : i32, i32
  }
  func.func @transform_2(%arg0: i32) -> (i32, i32) {
    %c0_i32 = arith.constant 0 : i32
    %c0_i32_0 = arith.constant 0 : i32
    %c0_i32_1 = arith.constant 0 : i32
    return %c0_i32, %c0_i32_0 : i32, i32
  }
  func.func @transform_3(%arg0: i32) -> (i32, i32) {
    %c0_i32 = arith.constant 0 : i32
    %c0_i32_0 = arith.constant 0 : i32
    return %arg0, %c0_i32 : i32, i32
  }
}

module attributes {stable_mosaic.version = 11 : i64} {
  func.func @_bn_stats_kernel(%arg0: i32, %arg1: memref<32x128xf32, #tpu.memory_space<vmem>>, %arg2: memref<1x128xf32, #tpu.memory_space<vmem>>, %arg3: memref<1x128xf32, #tpu.memory_space<vmem>>) attributes {dimension_semantics = [#tpu.dimension_semantics<arbitrary>], iteration_bounds = array<i64: 1>, scalar_prefetch = 0 : i64, scratch_operands = 0 : i64, tpu.core_type = #tpu.core_type<tc>, window_params = [{transform_indices = @transform_0, window_bounds = array<i64: 32, 128>}, {pipeline_mode = #tpu.pipeline_mode<synchronous>, transform_indices = @transform_1, window_bounds = array<i64: 1, 128>}, {pipeline_mode = #tpu.pipeline_mode<synchronous>, transform_indices = @transform_2, window_bounds = array<i64: 1, 128>}]} {
    %c0_i32 = arith.constant 0 : i32
    %0 = arith.cmpi eq, %arg0, %c0_i32 : i32
    %1 = arith.extui %0 : i1 to i32
    %c0_i32_0 = arith.constant 0 : i32
    %2 = arith.cmpi ne, %1, %c0_i32_0 : i32
    scf.if %2 {
      %cst_11 = arith.constant 0.000000e+00 : f32
      %15 = vector.broadcast %cst_11 : f32 to vector<1x128xf32>
      %c0_12 = arith.constant 0 : index
      %c0_13 = arith.constant 0 : index
      %16 = vector.load %arg2[%c0_12, %c0_13] : memref<1x128xf32, #tpu.memory_space<vmem>>, vector<1x128xf32>
      tpu.vector_store %arg2[%c0_12, %c0_13], %15 {strides = array<i32>} : memref<1x128xf32, #tpu.memory_space<vmem>>, vector<1x128xf32>,
      %cst_14 = arith.constant 0.000000e+00 : f32
      %17 = vector.broadcast %cst_14 : f32 to vector<1x128xf32>
      %c0_15 = arith.constant 0 : index
      %c0_16 = arith.constant 0 : index
      %18 = vector.load %arg3[%c0_15, %c0_16] : memref<1x128xf32, #tpu.memory_space<vmem>>, vector<1x128xf32>
      tpu.vector_store %arg3[%c0_15, %c0_16], %17 {strides = array<i32>} : memref<1x128xf32, #tpu.memory_space<vmem>>, vector<1x128xf32>,
    } else {
    }
    %c0 = arith.constant 0 : index
    %c0_1 = arith.constant 0 : index
    %3 = vector.load %arg1[%c0, %c0_1] : memref<32x128xf32, #tpu.memory_space<vmem>>, vector<32x128xf32>
    %c0_2 = arith.constant 0 : index
    %c0_3 = arith.constant 0 : index
    %4 = vector.load %arg2[%c0_2, %c0_3] : memref<1x128xf32, #tpu.memory_space<vmem>>, vector<1x128xf32>
    %cst = arith.constant dense<0.000000e+00> : vector<128xf32>
    %5 = vector.multi_reduction <add>, %3, %cst [0] : vector<32x128xf32> to vector<128xf32>
    %6 = vector.shape_cast %5 : vector<128xf32> to vector<1x128xf32>
    %7 = arith.addf %4, %6 : vector<1x128xf32>
    %c0_4 = arith.constant 0 : index
    %c0_5 = arith.constant 0 : index
    %8 = vector.load %arg2[%c0_4, %c0_5] : memref<1x128xf32, #tpu.memory_space<vmem>>, vector<1x128xf32>
    tpu.vector_store %arg2[%c0_4, %c0_5], %7 {strides = array<i32>} : memref<1x128xf32, #tpu.memory_space<vmem>>, vector<1x128xf32>,
    %c0_6 = arith.constant 0 : index
    %c0_7 = arith.constant 0 : index
    %9 = vector.load %arg3[%c0_6, %c0_7] : memref<1x128xf32, #tpu.memory_space<vmem>>, vector<1x128xf32>
    %10 = arith.mulf %3, %3 : vector<32x128xf32>
    %cst_8 = arith.constant dense<0.000000e+00> : vector<128xf32>
    %11 = vector.multi_reduction <add>, %10, %cst_8 [0] : vector<32x128xf32> to vector<128xf32>
    %12 = vector.shape_cast %11 : vector<128xf32> to vector<1x128xf32>
    %13 = arith.addf %9, %12 : vector<1x128xf32>
    %c0_9 = arith.constant 0 : index
    %c0_10 = arith.constant 0 : index
    %14 = vector.load %arg3[%c0_9, %c0_10] : memref<1x128xf32, #tpu.memory_space<vmem>>, vector<1x128xf32>
    tpu.vector_store %arg3[%c0_9, %c0_10], %13 {strides = array<i32>} : memref<1x128xf32, #tpu.memory_space<vmem>>, vector<1x128xf32>,
    return
  }
  func.func @transform_0(%arg0: i32) -> (i32, i32) {
    %c0_i32 = arith.constant 0 : i32
    %c0_i32_0 = arith.constant 0 : i32
    return %arg0, %c0_i32 : i32, i32
  }
  func.func @transform_1(%arg0: i32) -> (i32, i32) {
    %c0_i32 = arith.constant 0 : i32
    %c0_i32_0 = arith.constant 0 : i32
    %c0_i32_1 = arith.constant 0 : i32
    return %c0_i32, %c0_i32_0 : i32, i32
  }
  func.func @transform_2(%arg0: i32) -> (i32, i32) {
    %c0_i32 = arith.constant 0 : i32
    %c0_i32_0 = arith.constant 0 : i32
    %c0_i32_1 = arith.constant 0 : i32
    return %c0_i32, %c0_i32_0 : i32, i32
  }
}

module attributes {stable_mosaic.version = 11 : i64} {
  func.func @_affine_lrelu_kernel(%arg0: i32, %arg1: memref<32x128xf32, #tpu.memory_space<vmem>>, %arg2: memref<1x128xf32, #tpu.memory_space<vmem>>, %arg3: memref<1x128xf32, #tpu.memory_space<vmem>>, %arg4: memref<32x128xf32, #tpu.memory_space<vmem>>) attributes {dimension_semantics = [#tpu.dimension_semantics<parallel>], iteration_bounds = array<i64: 1>, scalar_prefetch = 0 : i64, scratch_operands = 0 : i64, tpu.core_type = #tpu.core_type<tc>, window_params = [{transform_indices = @transform_0, window_bounds = array<i64: 32, 128>}, {pipeline_mode = #tpu.pipeline_mode<synchronous>, transform_indices = @transform_1, window_bounds = array<i64: 1, 128>}, {pipeline_mode = #tpu.pipeline_mode<synchronous>, transform_indices = @transform_2, window_bounds = array<i64: 1, 128>}, {transform_indices = @transform_3, window_bounds = array<i64: 32, 128>}]} {
    %c0 = arith.constant 0 : index
    %c0_0 = arith.constant 0 : index
    %0 = vector.load %arg1[%c0, %c0_0] : memref<32x128xf32, #tpu.memory_space<vmem>>, vector<32x128xf32>
    %c0_1 = arith.constant 0 : index
    %c0_2 = arith.constant 0 : index
    %1 = vector.load %arg2[%c0_1, %c0_2] : memref<1x128xf32, #tpu.memory_space<vmem>>, vector<1x128xf32>
    %2 = vector.broadcast %1 : vector<1x128xf32> to vector<32x128xf32>
    %3 = arith.mulf %0, %2 : vector<32x128xf32>
    %c0_3 = arith.constant 0 : index
    %c0_4 = arith.constant 0 : index
    %4 = vector.load %arg3[%c0_3, %c0_4] : memref<1x128xf32, #tpu.memory_space<vmem>>, vector<1x128xf32>
    %5 = vector.broadcast %4 : vector<1x128xf32> to vector<32x128xf32>
    %6 = arith.addf %3, %5 : vector<32x128xf32>
    %cst = arith.constant 0.000000e+00 : f32
    %7 = vector.broadcast %cst : f32 to vector<32x128xf32>
    %8 = arith.cmpf oge, %6, %7 : vector<32x128xf32>
    %cst_5 = arith.constant 2.000000e-01 : f32
    %9 = vector.broadcast %cst_5 : f32 to vector<32x128xf32>
    %10 = arith.mulf %9, %6 : vector<32x128xf32>
    %11 = arith.select %8, %6, %10 : vector<32x128xi1>, vector<32x128xf32>
    %c0_6 = arith.constant 0 : index
    %c0_7 = arith.constant 0 : index
    %12 = vector.load %arg4[%c0_6, %c0_7] : memref<32x128xf32, #tpu.memory_space<vmem>>, vector<32x128xf32>
    tpu.vector_store %arg4[%c0_6, %c0_7], %11 {strides = array<i32>} : memref<32x128xf32, #tpu.memory_space<vmem>>, vector<32x128xf32>,
    return
  }
  func.func @transform_0(%arg0: i32) -> (i32, i32) {
    %c0_i32 = arith.constant 0 : i32
    %c0_i32_0 = arith.constant 0 : i32
    return %arg0, %c0_i32 : i32, i32
  }
  func.func @transform_1(%arg0: i32) -> (i32, i32) {
    %c0_i32 = arith.constant 0 : i32
    %c0_i32_0 = arith.constant 0 : i32
    %c0_i32_1 = arith.constant 0 : i32
    return %c0_i32, %c0_i32_0 : i32, i32
  }
  func.func @transform_2(%arg0: i32) -> (i32, i32) {
    %c0_i32 = arith.constant 0 : i32
    %c0_i32_0 = arith.constant 0 : i32
    %c0_i32_1 = arith.constant 0 : i32
    return %c0_i32, %c0_i32_0 : i32, i32
  }
  func.func @transform_3(%arg0: i32) -> (i32, i32) {
    %c0_i32 = arith.constant 0 : i32
    %c0_i32_0 = arith.constant 0 : i32
    return %arg0, %c0_i32 : i32, i32
  }
}

module attributes {stable_mosaic.version = 11 : i64} {
  func.func @_conv_matmul_kernel(%arg0: i32, %arg1: i32, %arg2: i32, %arg3: memref<32x256xbf16, #tpu.memory_space<vmem>>, %arg4: memref<256x128xbf16, #tpu.memory_space<vmem>>, %arg5: memref<1x128xf32, #tpu.memory_space<vmem>>, %arg6: memref<32x128xf32, #tpu.memory_space<vmem>>, %arg7: memref<32x128xf32, #tpu.memory_space<vmem>>) attributes {dimension_semantics = [#tpu.dimension_semantics<parallel>, #tpu.dimension_semantics<parallel>, #tpu.dimension_semantics<arbitrary>], iteration_bounds = array<i64: 1, 1, 1>, scalar_prefetch = 0 : i64, scratch_operands = 1 : i64, tpu.core_type = #tpu.core_type<tc>, window_params = [{transform_indices = @transform_0, window_bounds = array<i64: 32, 256>}, {transform_indices = @transform_1, window_bounds = array<i64: 256, 128>}, {transform_indices = @transform_2, window_bounds = array<i64: 1, 128>}, {transform_indices = @transform_3, window_bounds = array<i64: 32, 128>}]} {
    %c0_i32 = arith.constant 0 : i32
    %0 = arith.cmpi eq, %arg2, %c0_i32 : i32
    %1 = arith.extui %0 : i1 to i32
    %c0_i32_0 = arith.constant 0 : i32
    %2 = arith.cmpi ne, %1, %c0_i32_0 : i32
    scf.if %2 {
      %cst_10 = arith.constant 0.000000e+00 : f32
      %12 = vector.broadcast %cst_10 : f32 to vector<32x128xf32>
      %c0_11 = arith.constant 0 : index
      %c0_12 = arith.constant 0 : index
      %13 = vector.load %arg7[%c0_11, %c0_12] : memref<32x128xf32, #tpu.memory_space<vmem>>, vector<32x128xf32>
      tpu.vector_store %arg7[%c0_11, %c0_12], %12 {strides = array<i32>} : memref<32x128xf32, #tpu.memory_space<vmem>>, vector<32x128xf32>,
    } else {
    }
    %c0 = arith.constant 0 : index
    %c0_1 = arith.constant 0 : index
    %3 = vector.load %arg7[%c0, %c0_1] : memref<32x128xf32, #tpu.memory_space<vmem>>, vector<32x128xf32>
    %c0_2 = arith.constant 0 : index
    %c0_3 = arith.constant 0 : index
    %4 = vector.load %arg3[%c0_2, %c0_3] : memref<32x256xbf16, #tpu.memory_space<vmem>>, vector<32x256xbf16>
    %c0_4 = arith.constant 0 : index
    %c0_5 = arith.constant 0 : index
    %5 = vector.load %arg4[%c0_4, %c0_5] : memref<256x128xbf16, #tpu.memory_space<vmem>>, vector<256x128xbf16>
    %cst = arith.constant dense<0.000000e+00> : vector<32x128xf32>
    %6 = tpu.matmul %4, %5, %cst {dimension_numbers = #tpu.dot_dimension_numbers<[1], [0], [0], [1], [0, 0, 1, 1], [], []>} : vector<32x256xbf16>, vector<256x128xbf16>, vector<32x128xf32> -> vector<32x128xf32>
    %7 = arith.addf %3, %6 : vector<32x128xf32>
    %c0_6 = arith.constant 0 : index
    %c0_7 = arith.constant 0 : index
    %8 = vector.load %arg7[%c0_6, %c0_7] : memref<32x128xf32, #tpu.memory_space<vmem>>, vector<32x128xf32>
    tpu.vector_store %arg7[%c0_6, %c0_7], %7 {strides = array<i32>} : memref<32x128xf32, #tpu.memory_space<vmem>>, vector<32x128xf32>,
    %c0_i32_8 = arith.constant 0 : i32
    %9 = arith.cmpi eq, %arg2, %c0_i32_8 : i32
    %10 = arith.extui %9 : i1 to i32
    %c0_i32_9 = arith.constant 0 : i32
    %11 = arith.cmpi ne, %10, %c0_i32_9 : i32
    scf.if %11 {
      %c0_10 = arith.constant 0 : index
      %c0_11 = arith.constant 0 : index
      %12 = vector.load %arg7[%c0_10, %c0_11] : memref<32x128xf32, #tpu.memory_space<vmem>>, vector<32x128xf32>
      %c0_12 = arith.constant 0 : index
      %c0_13 = arith.constant 0 : index
      %13 = vector.load %arg5[%c0_12, %c0_13] : memref<1x128xf32, #tpu.memory_space<vmem>>, vector<1x128xf32>
      %14 = vector.broadcast %13 : vector<1x128xf32> to vector<32x128xf32>
      %15 = arith.addf %12, %14 : vector<32x128xf32>
      %c0_14 = arith.constant 0 : index
      %c0_15 = arith.constant 0 : index
      %16 = vector.load %arg6[%c0_14, %c0_15] : memref<32x128xf32, #tpu.memory_space<vmem>>, vector<32x128xf32>
      tpu.vector_store %arg6[%c0_14, %c0_15], %15 {strides = array<i32>} : memref<32x128xf32, #tpu.memory_space<vmem>>, vector<32x128xf32>,
    } else {
    }
    return
  }
  func.func @transform_0(%arg0: i32, %arg1: i32, %arg2: i32) -> (i32, i32) {
    %c0_i32 = arith.constant 0 : i32
    return %arg0, %arg2 : i32, i32
  }
  func.func @transform_1(%arg0: i32, %arg1: i32, %arg2: i32) -> (i32, i32) {
    %c0_i32 = arith.constant 0 : i32
    return %arg2, %arg1 : i32, i32
  }
  func.func @transform_2(%arg0: i32, %arg1: i32, %arg2: i32) -> (i32, i32) {
    %c0_i32 = arith.constant 0 : i32
    %c0_i32_0 = arith.constant 0 : i32
    return %c0_i32, %arg1 : i32, i32
  }
  func.func @transform_3(%arg0: i32, %arg1: i32, %arg2: i32) -> (i32, i32) {
    %c0_i32 = arith.constant 0 : i32
    return %arg0, %arg1 : i32, i32
  }
}

module attributes {stable_mosaic.version = 11 : i64} {
  func.func @_conv_matmul_kernel(%arg0: i32, %arg1: i32, %arg2: i32, %arg3: memref<32x512xbf16, #tpu.memory_space<vmem>>, %arg4: memref<512x128xbf16, #tpu.memory_space<vmem>>, %arg5: memref<1x128xf32, #tpu.memory_space<vmem>>, %arg6: memref<32x128xf32, #tpu.memory_space<vmem>>, %arg7: memref<32x128xf32, #tpu.memory_space<vmem>>) attributes {dimension_semantics = [#tpu.dimension_semantics<parallel>, #tpu.dimension_semantics<parallel>, #tpu.dimension_semantics<arbitrary>], iteration_bounds = array<i64: 1, 1, 1>, scalar_prefetch = 0 : i64, scratch_operands = 1 : i64, tpu.core_type = #tpu.core_type<tc>, window_params = [{transform_indices = @transform_0, window_bounds = array<i64: 32, 512>}, {transform_indices = @transform_1, window_bounds = array<i64: 512, 128>}, {transform_indices = @transform_2, window_bounds = array<i64: 1, 128>}, {transform_indices = @transform_3, window_bounds = array<i64: 32, 128>}]} {
    %c0_i32 = arith.constant 0 : i32
    %0 = arith.cmpi eq, %arg2, %c0_i32 : i32
    %1 = arith.extui %0 : i1 to i32
    %c0_i32_0 = arith.constant 0 : i32
    %2 = arith.cmpi ne, %1, %c0_i32_0 : i32
    scf.if %2 {
      %cst_10 = arith.constant 0.000000e+00 : f32
      %12 = vector.broadcast %cst_10 : f32 to vector<32x128xf32>
      %c0_11 = arith.constant 0 : index
      %c0_12 = arith.constant 0 : index
      %13 = vector.load %arg7[%c0_11, %c0_12] : memref<32x128xf32, #tpu.memory_space<vmem>>, vector<32x128xf32>
      tpu.vector_store %arg7[%c0_11, %c0_12], %12 {strides = array<i32>} : memref<32x128xf32, #tpu.memory_space<vmem>>, vector<32x128xf32>,
    } else {
    }
    %c0 = arith.constant 0 : index
    %c0_1 = arith.constant 0 : index
    %3 = vector.load %arg7[%c0, %c0_1] : memref<32x128xf32, #tpu.memory_space<vmem>>, vector<32x128xf32>
    %c0_2 = arith.constant 0 : index
    %c0_3 = arith.constant 0 : index
    %4 = vector.load %arg3[%c0_2, %c0_3] : memref<32x512xbf16, #tpu.memory_space<vmem>>, vector<32x512xbf16>
    %c0_4 = arith.constant 0 : index
    %c0_5 = arith.constant 0 : index
    %5 = vector.load %arg4[%c0_4, %c0_5] : memref<512x128xbf16, #tpu.memory_space<vmem>>, vector<512x128xbf16>
    %cst = arith.constant dense<0.000000e+00> : vector<32x128xf32>
    %6 = tpu.matmul %4, %5, %cst {dimension_numbers = #tpu.dot_dimension_numbers<[1], [0], [0], [1], [0, 0, 1, 1], [], []>} : vector<32x512xbf16>, vector<512x128xbf16>, vector<32x128xf32> -> vector<32x128xf32>
    %7 = arith.addf %3, %6 : vector<32x128xf32>
    %c0_6 = arith.constant 0 : index
    %c0_7 = arith.constant 0 : index
    %8 = vector.load %arg7[%c0_6, %c0_7] : memref<32x128xf32, #tpu.memory_space<vmem>>, vector<32x128xf32>
    tpu.vector_store %arg7[%c0_6, %c0_7], %7 {strides = array<i32>} : memref<32x128xf32, #tpu.memory_space<vmem>>, vector<32x128xf32>,
    %c0_i32_8 = arith.constant 0 : i32
    %9 = arith.cmpi eq, %arg2, %c0_i32_8 : i32
    %10 = arith.extui %9 : i1 to i32
    %c0_i32_9 = arith.constant 0 : i32
    %11 = arith.cmpi ne, %10, %c0_i32_9 : i32
    scf.if %11 {
      %c0_10 = arith.constant 0 : index
      %c0_11 = arith.constant 0 : index
      %12 = vector.load %arg7[%c0_10, %c0_11] : memref<32x128xf32, #tpu.memory_space<vmem>>, vector<32x128xf32>
      %c0_12 = arith.constant 0 : index
      %c0_13 = arith.constant 0 : index
      %13 = vector.load %arg5[%c0_12, %c0_13] : memref<1x128xf32, #tpu.memory_space<vmem>>, vector<1x128xf32>
      %14 = vector.broadcast %13 : vector<1x128xf32> to vector<32x128xf32>
      %15 = arith.addf %12, %14 : vector<32x128xf32>
      %c0_14 = arith.constant 0 : index
      %c0_15 = arith.constant 0 : index
      %16 = vector.load %arg6[%c0_14, %c0_15] : memref<32x128xf32, #tpu.memory_space<vmem>>, vector<32x128xf32>
      tpu.vector_store %arg6[%c0_14, %c0_15], %15 {strides = array<i32>} : memref<32x128xf32, #tpu.memory_space<vmem>>, vector<32x128xf32>,
    } else {
    }
    return
  }
  func.func @transform_0(%arg0: i32, %arg1: i32, %arg2: i32) -> (i32, i32) {
    %c0_i32 = arith.constant 0 : i32
    return %arg0, %arg2 : i32, i32
  }
  func.func @transform_1(%arg0: i32, %arg1: i32, %arg2: i32) -> (i32, i32) {
    %c0_i32 = arith.constant 0 : i32
    return %arg2, %arg1 : i32, i32
  }
  func.func @transform_2(%arg0: i32, %arg1: i32, %arg2: i32) -> (i32, i32) {
    %c0_i32 = arith.constant 0 : i32
    %c0_i32_0 = arith.constant 0 : i32
    return %c0_i32, %arg1 : i32, i32
  }
  func.func @transform_3(%arg0: i32, %arg1: i32, %arg2: i32) -> (i32, i32) {
    %c0_i32 = arith.constant 0 : i32
    return %arg0, %arg1 : i32, i32
  }
}

module attributes {stable_mosaic.version = 11 : i64} {
  func.func @_bn_stats_kernel(%arg0: i32, %arg1: memref<24x128xf32, #tpu.memory_space<vmem>>, %arg2: memref<1x128xf32, #tpu.memory_space<vmem>>, %arg3: memref<1x128xf32, #tpu.memory_space<vmem>>) attributes {dimension_semantics = [#tpu.dimension_semantics<arbitrary>], iteration_bounds = array<i64: 1>, scalar_prefetch = 0 : i64, scratch_operands = 0 : i64, tpu.core_type = #tpu.core_type<tc>, window_params = [{transform_indices = @transform_0, window_bounds = array<i64: 24, 128>}, {pipeline_mode = #tpu.pipeline_mode<synchronous>, transform_indices = @transform_1, window_bounds = array<i64: 1, 128>}, {pipeline_mode = #tpu.pipeline_mode<synchronous>, transform_indices = @transform_2, window_bounds = array<i64: 1, 128>}]} {
    %c0_i32 = arith.constant 0 : i32
    %0 = arith.cmpi eq, %arg0, %c0_i32 : i32
    %1 = arith.extui %0 : i1 to i32
    %c0_i32_0 = arith.constant 0 : i32
    %2 = arith.cmpi ne, %1, %c0_i32_0 : i32
    scf.if %2 {
      %cst_11 = arith.constant 0.000000e+00 : f32
      %15 = vector.broadcast %cst_11 : f32 to vector<1x128xf32>
      %c0_12 = arith.constant 0 : index
      %c0_13 = arith.constant 0 : index
      %16 = vector.load %arg2[%c0_12, %c0_13] : memref<1x128xf32, #tpu.memory_space<vmem>>, vector<1x128xf32>
      tpu.vector_store %arg2[%c0_12, %c0_13], %15 {strides = array<i32>} : memref<1x128xf32, #tpu.memory_space<vmem>>, vector<1x128xf32>,
      %cst_14 = arith.constant 0.000000e+00 : f32
      %17 = vector.broadcast %cst_14 : f32 to vector<1x128xf32>
      %c0_15 = arith.constant 0 : index
      %c0_16 = arith.constant 0 : index
      %18 = vector.load %arg3[%c0_15, %c0_16] : memref<1x128xf32, #tpu.memory_space<vmem>>, vector<1x128xf32>
      tpu.vector_store %arg3[%c0_15, %c0_16], %17 {strides = array<i32>} : memref<1x128xf32, #tpu.memory_space<vmem>>, vector<1x128xf32>,
    } else {
    }
    %c0 = arith.constant 0 : index
    %c0_1 = arith.constant 0 : index
    %3 = vector.load %arg1[%c0, %c0_1] : memref<24x128xf32, #tpu.memory_space<vmem>>, vector<24x128xf32>
    %c0_2 = arith.constant 0 : index
    %c0_3 = arith.constant 0 : index
    %4 = vector.load %arg2[%c0_2, %c0_3] : memref<1x128xf32, #tpu.memory_space<vmem>>, vector<1x128xf32>
    %cst = arith.constant dense<0.000000e+00> : vector<128xf32>
    %5 = vector.multi_reduction <add>, %3, %cst [0] : vector<24x128xf32> to vector<128xf32>
    %6 = vector.shape_cast %5 : vector<128xf32> to vector<1x128xf32>
    %7 = arith.addf %4, %6 : vector<1x128xf32>
    %c0_4 = arith.constant 0 : index
    %c0_5 = arith.constant 0 : index
    %8 = vector.load %arg2[%c0_4, %c0_5] : memref<1x128xf32, #tpu.memory_space<vmem>>, vector<1x128xf32>
    tpu.vector_store %arg2[%c0_4, %c0_5], %7 {strides = array<i32>} : memref<1x128xf32, #tpu.memory_space<vmem>>, vector<1x128xf32>,
    %c0_6 = arith.constant 0 : index
    %c0_7 = arith.constant 0 : index
    %9 = vector.load %arg3[%c0_6, %c0_7] : memref<1x128xf32, #tpu.memory_space<vmem>>, vector<1x128xf32>
    %10 = arith.mulf %3, %3 : vector<24x128xf32>
    %cst_8 = arith.constant dense<0.000000e+00> : vector<128xf32>
    %11 = vector.multi_reduction <add>, %10, %cst_8 [0] : vector<24x128xf32> to vector<128xf32>
    %12 = vector.shape_cast %11 : vector<128xf32> to vector<1x128xf32>
    %13 = arith.addf %9, %12 : vector<1x128xf32>
    %c0_9 = arith.constant 0 : index
    %c0_10 = arith.constant 0 : index
    %14 = vector.load %arg3[%c0_9, %c0_10] : memref<1x128xf32, #tpu.memory_space<vmem>>, vector<1x128xf32>
    tpu.vector_store %arg3[%c0_9, %c0_10], %13 {strides = array<i32>} : memref<1x128xf32, #tpu.memory_space<vmem>>, vector<1x128xf32>,
    return
  }
  func.func @transform_0(%arg0: i32) -> (i32, i32) {
    %c0_i32 = arith.constant 0 : i32
    %c0_i32_0 = arith.constant 0 : i32
    return %arg0, %c0_i32 : i32, i32
  }
  func.func @transform_1(%arg0: i32) -> (i32, i32) {
    %c0_i32 = arith.constant 0 : i32
    %c0_i32_0 = arith.constant 0 : i32
    %c0_i32_1 = arith.constant 0 : i32
    return %c0_i32, %c0_i32_0 : i32, i32
  }
  func.func @transform_2(%arg0: i32) -> (i32, i32) {
    %c0_i32 = arith.constant 0 : i32
    %c0_i32_0 = arith.constant 0 : i32
    %c0_i32_1 = arith.constant 0 : i32
    return %c0_i32, %c0_i32_0 : i32, i32
  }
}

module attributes {stable_mosaic.version = 11 : i64} {
  func.func @_affine_lrelu_kernel(%arg0: i32, %arg1: memref<24x128xf32, #tpu.memory_space<vmem>>, %arg2: memref<1x128xf32, #tpu.memory_space<vmem>>, %arg3: memref<1x128xf32, #tpu.memory_space<vmem>>, %arg4: memref<24x128xf32, #tpu.memory_space<vmem>>) attributes {dimension_semantics = [#tpu.dimension_semantics<parallel>], iteration_bounds = array<i64: 1>, scalar_prefetch = 0 : i64, scratch_operands = 0 : i64, tpu.core_type = #tpu.core_type<tc>, window_params = [{transform_indices = @transform_0, window_bounds = array<i64: 24, 128>}, {pipeline_mode = #tpu.pipeline_mode<synchronous>, transform_indices = @transform_1, window_bounds = array<i64: 1, 128>}, {pipeline_mode = #tpu.pipeline_mode<synchronous>, transform_indices = @transform_2, window_bounds = array<i64: 1, 128>}, {transform_indices = @transform_3, window_bounds = array<i64: 24, 128>}]} {
    %c0 = arith.constant 0 : index
    %c0_0 = arith.constant 0 : index
    %0 = vector.load %arg1[%c0, %c0_0] : memref<24x128xf32, #tpu.memory_space<vmem>>, vector<24x128xf32>
    %c0_1 = arith.constant 0 : index
    %c0_2 = arith.constant 0 : index
    %1 = vector.load %arg2[%c0_1, %c0_2] : memref<1x128xf32, #tpu.memory_space<vmem>>, vector<1x128xf32>
    %2 = vector.broadcast %1 : vector<1x128xf32> to vector<24x128xf32>
    %3 = arith.mulf %0, %2 : vector<24x128xf32>
    %c0_3 = arith.constant 0 : index
    %c0_4 = arith.constant 0 : index
    %4 = vector.load %arg3[%c0_3, %c0_4] : memref<1x128xf32, #tpu.memory_space<vmem>>, vector<1x128xf32>
    %5 = vector.broadcast %4 : vector<1x128xf32> to vector<24x128xf32>
    %6 = arith.addf %3, %5 : vector<24x128xf32>
    %cst = arith.constant 0.000000e+00 : f32
    %7 = vector.broadcast %cst : f32 to vector<24x128xf32>
    %8 = arith.cmpf oge, %6, %7 : vector<24x128xf32>
    %cst_5 = arith.constant 2.000000e-01 : f32
    %9 = vector.broadcast %cst_5 : f32 to vector<24x128xf32>
    %10 = arith.mulf %9, %6 : vector<24x128xf32>
    %11 = arith.select %8, %6, %10 : vector<24x128xi1>, vector<24x128xf32>
    %c0_6 = arith.constant 0 : index
    %c0_7 = arith.constant 0 : index
    %12 = vector.load %arg4[%c0_6, %c0_7] : memref<24x128xf32, #tpu.memory_space<vmem>>, vector<24x128xf32>
    tpu.vector_store %arg4[%c0_6, %c0_7], %11 {strides = array<i32>} : memref<24x128xf32, #tpu.memory_space<vmem>>, vector<24x128xf32>,
    return
  }
  func.func @transform_0(%arg0: i32) -> (i32, i32) {
    %c0_i32 = arith.constant 0 : i32
    %c0_i32_0 = arith.constant 0 : i32
    return %arg0, %c0_i32 : i32, i32
  }
  func.func @transform_1(%arg0: i32) -> (i32, i32) {
    %c0_i32 = arith.constant 0 : i32
    %c0_i32_0 = arith.constant 0 : i32
    %c0_i32_1 = arith.constant 0 : i32
    return %c0_i32, %c0_i32_0 : i32, i32
  }
  func.func @transform_2(%arg0: i32) -> (i32, i32) {
    %c0_i32 = arith.constant 0 : i32
    %c0_i32_0 = arith.constant 0 : i32
    %c0_i32_1 = arith.constant 0 : i32
    return %c0_i32, %c0_i32_0 : i32, i32
  }
  func.func @transform_3(%arg0: i32) -> (i32, i32) {
    %c0_i32 = arith.constant 0 : i32
    %c0_i32_0 = arith.constant 0 : i32
    return %arg0, %c0_i32 : i32, i32
  }
}

module attributes {stable_mosaic.version = 11 : i64} {
  func.func @_conv_matmul_kernel(%arg0: i32, %arg1: i32, %arg2: i32, %arg3: memref<16x512xbf16, #tpu.memory_space<vmem>>, %arg4: memref<512x128xbf16, #tpu.memory_space<vmem>>, %arg5: memref<1x128xf32, #tpu.memory_space<vmem>>, %arg6: memref<16x128xf32, #tpu.memory_space<vmem>>, %arg7: memref<16x128xf32, #tpu.memory_space<vmem>>) attributes {dimension_semantics = [#tpu.dimension_semantics<parallel>, #tpu.dimension_semantics<parallel>, #tpu.dimension_semantics<arbitrary>], iteration_bounds = array<i64: 1, 1, 2>, scalar_prefetch = 0 : i64, scratch_operands = 1 : i64, tpu.core_type = #tpu.core_type<tc>, window_params = [{transform_indices = @transform_0, window_bounds = array<i64: 16, 512>}, {transform_indices = @transform_1, window_bounds = array<i64: 512, 128>}, {transform_indices = @transform_2, window_bounds = array<i64: 1, 128>}, {transform_indices = @transform_3, window_bounds = array<i64: 16, 128>}]} {
    %c0_i32 = arith.constant 0 : i32
    %0 = arith.cmpi eq, %arg2, %c0_i32 : i32
    %1 = arith.extui %0 : i1 to i32
    %c0_i32_0 = arith.constant 0 : i32
    %2 = arith.cmpi ne, %1, %c0_i32_0 : i32
    scf.if %2 {
      %cst_9 = arith.constant 0.000000e+00 : f32
      %12 = vector.broadcast %cst_9 : f32 to vector<16x128xf32>
      %c0_10 = arith.constant 0 : index
      %c0_11 = arith.constant 0 : index
      %13 = vector.load %arg7[%c0_10, %c0_11] : memref<16x128xf32, #tpu.memory_space<vmem>>, vector<16x128xf32>
      tpu.vector_store %arg7[%c0_10, %c0_11], %12 {strides = array<i32>} : memref<16x128xf32, #tpu.memory_space<vmem>>, vector<16x128xf32>,
    } else {
    }
    %c0 = arith.constant 0 : index
    %c0_1 = arith.constant 0 : index
    %3 = vector.load %arg7[%c0, %c0_1] : memref<16x128xf32, #tpu.memory_space<vmem>>, vector<16x128xf32>
    %c0_2 = arith.constant 0 : index
    %c0_3 = arith.constant 0 : index
    %4 = vector.load %arg3[%c0_2, %c0_3] : memref<16x512xbf16, #tpu.memory_space<vmem>>, vector<16x512xbf16>
    %c0_4 = arith.constant 0 : index
    %c0_5 = arith.constant 0 : index
    %5 = vector.load %arg4[%c0_4, %c0_5] : memref<512x128xbf16, #tpu.memory_space<vmem>>, vector<512x128xbf16>
    %cst = arith.constant dense<0.000000e+00> : vector<16x128xf32>
    %6 = tpu.matmul %4, %5, %cst {dimension_numbers = #tpu.dot_dimension_numbers<[1], [0], [0], [1], [0, 0, 1, 1], [], []>} : vector<16x512xbf16>, vector<512x128xbf16>, vector<16x128xf32> -> vector<16x128xf32>
    %7 = arith.addf %3, %6 : vector<16x128xf32>
    %c0_6 = arith.constant 0 : index
    %c0_7 = arith.constant 0 : index
    %8 = vector.load %arg7[%c0_6, %c0_7] : memref<16x128xf32, #tpu.memory_space<vmem>>, vector<16x128xf32>
    tpu.vector_store %arg7[%c0_6, %c0_7], %7 {strides = array<i32>} : memref<16x128xf32, #tpu.memory_space<vmem>>, vector<16x128xf32>,
    %c1_i32 = arith.constant 1 : i32
    %9 = arith.cmpi eq, %arg2, %c1_i32 : i32
    %10 = arith.extui %9 : i1 to i32
    %c0_i32_8 = arith.constant 0 : i32
    %11 = arith.cmpi ne, %10, %c0_i32_8 : i32
    scf.if %11 {
      %c0_9 = arith.constant 0 : index
      %c0_10 = arith.constant 0 : index
      %12 = vector.load %arg7[%c0_9, %c0_10] : memref<16x128xf32, #tpu.memory_space<vmem>>, vector<16x128xf32>
      %c0_11 = arith.constant 0 : index
      %c0_12 = arith.constant 0 : index
      %13 = vector.load %arg5[%c0_11, %c0_12] : memref<1x128xf32, #tpu.memory_space<vmem>>, vector<1x128xf32>
      %14 = vector.broadcast %13 : vector<1x128xf32> to vector<16x128xf32>
      %15 = arith.addf %12, %14 : vector<16x128xf32>
      %c0_13 = arith.constant 0 : index
      %c0_14 = arith.constant 0 : index
      %16 = vector.load %arg6[%c0_13, %c0_14] : memref<16x128xf32, #tpu.memory_space<vmem>>, vector<16x128xf32>
      tpu.vector_store %arg6[%c0_13, %c0_14], %15 {strides = array<i32>} : memref<16x128xf32, #tpu.memory_space<vmem>>, vector<16x128xf32>,
    } else {
    }
    return
  }
  func.func @transform_0(%arg0: i32, %arg1: i32, %arg2: i32) -> (i32, i32) {
    %c0_i32 = arith.constant 0 : i32
    return %arg0, %arg2 : i32, i32
  }
  func.func @transform_1(%arg0: i32, %arg1: i32, %arg2: i32) -> (i32, i32) {
    %c0_i32 = arith.constant 0 : i32
    return %arg2, %arg1 : i32, i32
  }
  func.func @transform_2(%arg0: i32, %arg1: i32, %arg2: i32) -> (i32, i32) {
    %c0_i32 = arith.constant 0 : i32
    %c0_i32_0 = arith.constant 0 : i32
    return %c0_i32, %arg1 : i32, i32
  }
  func.func @transform_3(%arg0: i32, %arg1: i32, %arg2: i32) -> (i32, i32) {
    %c0_i32 = arith.constant 0 : i32
    return %arg0, %arg1 : i32, i32
  }
}

</mosaic_0001>

<bundles_post_ra>
// kernel: nlayer_discriminator_forward.11
= control target key start
LH: loop header
LB: loop body
LE: loop exit
PB: predicated region body
PF: predicated region fallthrough
CT: control target
= control target key end

     0   :  { %s1784_s1 = inlined_call_operand.vmem [shape: bf16[128,128], index: 1, kind: input, shape index: {}]   ;;  %s1785_s2 = inlined_call_operand.vmem [shape: f32[1,128], index: 2, kind: input, shape index: {}]   ;;  %s1786_s0 = inlined_call_operand.vmem [shape: bf16[512,128], index: 0, kind: input, shape index: {}]   ;;  %s1787_s3 = inlined_call_operand.vmem [shape: f32[512,128], index: 3, kind: output, shape index: {}]  }
   0x1   :  { %v1357_v0 = vld [vmem:[%s1784_s1 + $0x38] sm:$0xff]  ;;  %v1356_v1 = vld [vmem:[%s1784_s1 + $0x30] sm:$0xff]  ;;  %v1355_v2 = vld [vmem:[%s1784_s1 + $0x28] sm:$0xff] }
   0x2   :  { %466 = vmatpush.bf16.msra.mxu0 %v1357_v0  ;;  %1358 = vmatpush.bf16.msra.mxu1 %v1357_v0  ;;  %v1354_v3 = vld [vmem:[%s1784_s1 + $0x20] sm:$0xff]  ;;  %v1353_v4 = vld [vmem:[%s1784_s1 + $0x18] sm:$0xff]  ;;  %v1352_v5 = vld [vmem:[%s1784_s1 + $0x10] sm:$0xff] }
   0x3   :  { %1359 = vmatpush.bf16.msra.mxu2 %v1357_v0  ;;  %1360 = vmatpush.bf16.msra.mxu3 %v1357_v0  ;;  %v1351_v6 = vld [vmem:[%s1784_s1 + $0x8] sm:$0xff]  ;;  %v1350_v7 = vld [vmem:[%s1784_s1] sm:$0xff]  ;;  %v1320_v16 = vld [vmem:[%s1786_s0 + $0x10] sm:$0xff] }
   0x4   :  { %v1318_v8 = vld [vmem:[%s1786_s0] sm:$0xff]  ;;  %v1319_v12 = vld [vmem:[%s1786_s0 + $0x8] sm:$0xff]  ;;  %v1328_v17 = vld [vmem:[%s1786_s0 + $0x50] sm:$0xff] }
   0x5   :  { %v1326_v9 = vld [vmem:[%s1786_s0 + $0x40] sm:$0xff]  ;;  %v1327_v13 = vld [vmem:[%s1786_s0 + $0x48] sm:$0xff]  ;;  %v1336_v18 = vld [vmem:[%s1786_s0 + $0x90] sm:$0xff] }
   0x6   :  { %467 = vmatpush.bf16.msra.mxu0 %v1356_v1  ;;  %1361 = vmatpush.bf16.msra.mxu1 %v1356_v1  ;;  %v1334_v10 = vld [vmem:[%s1786_s0 + $0x80] sm:$0xff]  ;;  %v1335_v14 = vld [vmem:[%s1786_s0 + $0x88] sm:$0xff]  ;;  %v1344_v19 = vld [vmem:[%s1786_s0 + $0xd0] sm:$0xff] }
   0x7   :  { %1362 = vmatpush.bf16.msra.mxu2 %v1356_v1  ;;  %1363 = vmatpush.bf16.msra.mxu3 %v1356_v1  ;;  %v1342_v11 = vld [vmem:[%s1786_s0 + $0xc0] sm:$0xff]  ;;  %v1343_v15 = vld [vmem:[%s1786_s0 + $0xc8] sm:$0xff]  ;;  %v1321_v20 = vld [vmem:[%s1786_s0 + $0x18] sm:$0xff] }
   0x8   :  { %v1329_v21 = vld [vmem:[%s1786_s0 + $0x58] sm:$0xff]  ;;  %v1322_v24 = vld [vmem:[%s1786_s0 + $0x20] sm:$0xff]  ;;  %v1323_v28 = vld [vmem:[%s1786_s0 + $0x28] sm:$0xff] }
   0x9   :  { %v1337_v22 = vld [vmem:[%s1786_s0 + $0x98] sm:$0xff]  ;;  %v1330_v25 = vld [vmem:[%s1786_s0 + $0x60] sm:$0xff]  ;;  %v1331_v29 = vld [vmem:[%s1786_s0 + $0x68] sm:$0xff] }
   0xa   :  { %468 = vmatpush.bf16.msra.mxu0 %v1355_v2  ;;  %1364 = vmatpush.bf16.msra.mxu1 %v1355_v2  ;;  %v1345_v23 = vld [vmem:[%s1786_s0 + $0xd8] sm:$0xff]  ;;  %v1338_v26 = vld [vmem:[%s1786_s0 + $0xa0] sm:$0xff]  ;;  %v1339_v30 = vld [vmem:[%s1786_s0 + $0xa8] sm:$0xff] }
   0xb   :  { %1365 = vmatpush.bf16.msra.mxu2 %v1355_v2  ;;  %1366 = vmatpush.bf16.msra.mxu3 %v1355_v2  ;;  %v1346_v27 = vld [vmem:[%s1786_s0 + $0xe0] sm:$0xff]  ;;  %v1347_v31 = vld [vmem:[%s1786_s0 + $0xe8] sm:$0xff]  ;;  %v1324_v32 = vld [vmem:[%s1786_s0 + $0x30] sm:$0xff] }
   0xc   :  { %v1332_v33 = vld [vmem:[%s1786_s0 + $0x70] sm:$0xff]  ;;  %v1325_v36 = vld [vmem:[%s1786_s0 + $0x38] sm:$0xff]  ;;  %v1526_v40 = vld [vmem:[%s1785_s2] ss:$0 sm:$0xff] }
   0xd   :  { %v1340_v34 = vld [vmem:[%s1786_s0 + $0xb0] sm:$0xff]  ;;  %v1333_v37 = vld [vmem:[%s1786_s0 + $0x78] sm:$0xff] }
   0xe   :  { %469 = vmatpush.bf16.msra.mxu0 %v1354_v3  ;;  %1367 = vmatpush.bf16.msra.mxu1 %v1354_v3  ;;  %v1348_v35 = vld [vmem:[%s1786_s0 + $0xf0] sm:$0xff]  ;;  %v1341_v38 = vld [vmem:[%s1786_s0 + $0xb8] sm:$0xff] }
   0xf   :  { %1368 = vmatpush.bf16.msra.mxu2 %v1354_v3  ;;  %1369 = vmatpush.bf16.msra.mxu3 %v1354_v3  ;;  %v1349_v39 = vld [vmem:[%s1786_s0 + $0xf8] sm:$0xff] }
  0x12   :  { %470 = vmatpush.bf16.msra.mxu0 %v1353_v4  ;;  %1370 = vmatpush.bf16.msra.mxu1 %v1353_v4 }
  0x13   :  { %1371 = vmatpush.bf16.msra.mxu2 %v1353_v4  ;;  %1372 = vmatpush.bf16.msra.mxu3 %v1353_v4 }
  0x16   :  { %471 = vmatpush.bf16.msra.mxu0 %v1352_v5  ;;  %1373 = vmatpush.bf16.msra.mxu1 %v1352_v5 }
  0x17   :  { %1374 = vmatpush.bf16.msra.mxu2 %v1352_v5  ;;  %1375 = vmatpush.bf16.msra.mxu3 %v1352_v5 }
  0x1a   :  { %472 = vmatpush.bf16.msra.mxu0 %v1351_v6  ;;  %1376 = vmatpush.bf16.msra.mxu1 %v1351_v6 }
  0x1b   :  { %1377 = vmatpush.bf16.msra.mxu2 %v1351_v6  ;;  %1378 = vmatpush.bf16.msra.mxu3 %v1351_v6 }
  0x1e   :  { %473 = vmatpush.bf16.msra.mxu0 %v1350_v7  ;;  %1379 = vmatpush.bf16.msra.mxu1 %v1350_v7 }
  0x1f   :  { %1380 = vmatpush.bf16.msra.mxu2 %v1350_v7  ;;  %1381 = vmatpush.bf16.msra.mxu3 %v1350_v7 }
  0x21   :  { %474 = vmatmul.bf16.vlgmr.msra.gmra.mxu0 %v1318_v8  ;;  %514 = vmatmul.bf16.vlgmr.msra.gmra.mxu1 %v1326_v9 }
  0x22   :  { %554 = vmatmul.bf16.vlgmr.msra.gmra.mxu2 %v1334_v10  ;;  %594 = vmatmul.bf16.vlgmr.msra.gmra.mxu3 %v1342_v11 }
  0x31   :  { %479 = vmatmul.bf16.gmra.mxu0 %v1319_v12  ;;  %519 = vmatmul.bf16.gmra.mxu1 %v1327_v13 }
  0x32   :  { %559 = vmatmul.bf16.gmra.mxu2 %v1335_v14  ;;  %599 = vmatmul.bf16.gmra.mxu3 %v1343_v15 }
  0x41   :  { %484 = vmatmul.bf16.gmra.mxu0 %v1320_v16  ;;  %524 = vmatmul.bf16.gmra.mxu1 %v1328_v17 }
  0x42   :  { %564 = vmatmul.bf16.gmra.mxu2 %v1336_v18  ;;  %604 = vmatmul.bf16.gmra.mxu3 %v1344_v19 }
  0x51   :  { %489 = vmatmul.bf16.gmra.mxu0 %v1321_v20  ;;  %529 = vmatmul.bf16.gmra.mxu1 %v1329_v21 }
  0x52   :  { %569 = vmatmul.bf16.gmra.mxu2 %v1337_v22  ;;  %609 = vmatmul.bf16.gmra.mxu3 %v1345_v23 }
  0x61   :  { %494 = vmatmul.bf16.gmra.mxu0 %v1322_v24  ;;  %534 = vmatmul.bf16.gmra.mxu1 %v1330_v25 }
  0x62   :  { %574 = vmatmul.bf16.gmra.mxu2 %v1338_v26  ;;  %614 = vmatmul.bf16.gmra.mxu3 %v1346_v27 }
  0x71   :  { %499 = vmatmul.bf16.gmra.mxu0 %v1323_v28  ;;  %539 = vmatmul.bf16.gmra.mxu1 %v1331_v29 }
  0x72   :  { %579 = vmatmul.bf16.gmra.mxu2 %v1339_v30  ;;  %619 = vmatmul.bf16.gmra.mxu3 %v1347_v31 }
  0x81   :  { %504 = vmatmul.bf16.gmra.mxu0 %v1324_v32  ;;  %544 = vmatmul.bf16.gmra.mxu1 %v1332_v33 }
  0x82   :  { %584 = vmatmul.bf16.gmra.mxu2 %v1340_v34  ;;  %624 = vmatmul.bf16.gmra.mxu3 %v1348_v35 }
  0x91   :  { %509 = vmatmul.bf16.gmra.mxu0 %v1325_v36  ;;  %549 = vmatmul.bf16.gmra.mxu1 %v1333_v37 }
  0x92   :  { %589 = vmatmul.bf16.gmra.mxu2 %v1341_v38  ;;  %629 = vmatmul.bf16.gmra.mxu3 %v1349_v39 }
  0x9e   :  { %v475_v41 = vpop.f32.mrf.mxu0  ;;  %v515_v42 = vpop.f32.mrf.mxu1 }
  0x9f   :  { %v834_v43 = vadd.f32 %v1526_v40, %v475_v41  ;;  %v850_v44 = vadd.f32 %v1526_v40, %v515_v42 }
  0xa1   :  { %vm898_vm0 = vcmp.ge.f32.partialorder %v834_v43, 0.0  ;;  %v962_v45 = vmul.f32 0.2, %v834_v43  ;;  %vm914_vm1 = vcmp.ge.f32.partialorder %v850_v44, 0.0  ;;  %v978_v46 = vmul.f32 0.2, %v850_v44 }
  0xa3   :  { %v1026_v47 = vsel %vm898_vm0, %v834_v43, %v962_v45  ;;  %v1042_v48 = vsel %vm914_vm1, %v850_v44, %v978_v46 }
  0xa4   :  { %1090 = vst [vmem:[%s1787_s3] sm:$0xff] %v1026_v47 }
  0xa5   :  { %1106 = vst [vmem:[%s1787_s3 + $0x80] sm:$0xff] %v1042_v48  ;;  %v555_v49 = vpop.f32.mrf.mxu2  ;;  %v595_v50 = vpop.f32.mrf.mxu3 }
  0xa6   :  { %v866_v51 = vadd.f32 %v1526_v40, %v555_v49  ;;  %v882_v52 = vadd.f32 %v1526_v40, %v595_v50  ;;  %v477_v53 = vpop.f32.mrf.mxu0  ;;  %v517_v54 = vpop.f32.mrf.mxu1 }
  0xa7   :  { %v835_v55 = vadd.f32 %v1526_v40, %v477_v53  ;;  %v851_v56 = vadd.f32 %v1526_v40, %v517_v54 }
  0xa8   :  { %vm930_vm2 = vcmp.ge.f32.partialorder %v866_v51, 0.0  ;;  %v994_v57 = vmul.f32 0.2, %v866_v51  ;;  %vm946_vm3 = vcmp.ge.f32.partialorder %v882_v52, 0.0  ;;  %v1010_v58 = vmul.f32 0.2, %v882_v52 }
  0xa9   :  { %vm899_vm4 = vcmp.ge.f32.partialorder %v835_v55, 0.0  ;;  %v963_v59 = vmul.f32 0.2, %v835_v55  ;;  %vm915_vm5 = vcmp.ge.f32.partialorder %v851_v56, 0.0  ;;  %v979_v60 = vmul.f32 0.2, %v851_v56 }
  0xaa   :  { %v1058_v61 = vsel %vm930_vm2, %v866_v51, %v994_v57  ;;  %v1074_v62 = vsel %vm946_vm3, %v882_v52, %v1010_v58 }
  0xab   :  { %1122 = vst [vmem:[%s1787_s3 + $0x100] sm:$0xff] %v1058_v61  ;;  %v1027_v63 = vsel %vm899_vm4, %v835_v55, %v963_v59  ;;  %v1043_v0 = vsel %vm915_vm5, %v851_v56, %v979_v60 }
  0xac   :  { %1138 = vst [vmem:[%s1787_s3 + $0x180] sm:$0xff] %v1074_v62 }
  0xad   :  { %1091 = vst [vmem:[%s1787_s3 + $0x8] sm:$0xff] %v1027_v63  ;;  %v557_v1 = vpop.f32.mrf.mxu2  ;;  %v597_v2 = vpop.f32.mrf.mxu3 }
  0xae   :  { %1107 = vst [vmem:[%s1787_s3 + $0x88] sm:$0xff] %v1043_v0  ;;  %v867_v3 = vadd.f32 %v1526_v40, %v557_v1  ;;  %v883_v4 = vadd.f32 %v1526_v40, %v597_v2  ;;  %v480_v5 = vpop.f32.mrf.mxu0  ;;  %v520_v6 = vpop.f32.mrf.mxu1 }
  0xaf   :  { %v836_v7 = vadd.f32 %v1526_v40, %v480_v5  ;;  %v852_v8 = vadd.f32 %v1526_v40, %v520_v6 }
  0xb0   :  { %vm931_vm6 = vcmp.ge.f32.partialorder %v867_v3, 0.0  ;;  %v995_v9 = vmul.f32 0.2, %v867_v3  ;;  %vm947_vm7 = vcmp.ge.f32.partialorder %v883_v4, 0.0  ;;  %v1011_v10 = vmul.f32 0.2, %v883_v4 }
  0xb1   :  { %vm900_vm8 = vcmp.ge.f32.partialorder %v836_v7, 0.0  ;;  %v964_v11 = vmul.f32 0.2, %v836_v7  ;;  %vm916_vm9 = vcmp.ge.f32.partialorder %v852_v8, 0.0  ;;  %v980_v12 = vmul.f32 0.2, %v852_v8 }
  0xb2   :  { %v1059_v13 = vsel %vm931_vm6, %v867_v3, %v995_v9  ;;  %v1075_v14 = vsel %vm947_vm7, %v883_v4, %v1011_v10 }
  0xb3   :  { %1123 = vst [vmem:[%s1787_s3 + $0x108] sm:$0xff] %v1059_v13  ;;  %v1028_v15 = vsel %vm900_vm8, %v836_v7, %v964_v11  ;;  %v1044_v16 = vsel %vm916_vm9, %v852_v8, %v980_v12 }
  0xb4   :  { %1139 = vst [vmem:[%s1787_s3 + $0x188] sm:$0xff] %v1075_v14 }
  0xb5   :  { %1092 = vst [vmem:[%s1787_s3 + $0x10] sm:$0xff] %v1028_v15  ;;  %v560_v17 = vpop.f32.mrf.mxu2  ;;  %v600_v18 = vpop.f32.mrf.mxu3 }
  0xb6   :  { %1108 = vst [vmem:[%s1787_s3 + $0x90] sm:$0xff] %v1044_v16  ;;  %v868_v19 = vadd.f32 %v1526_v40, %v560_v17  ;;  %v884_v20 = vadd.f32 %v1526_v40, %v600_v18  ;;  %v482_v21 = vpop.f32.mrf.mxu0  ;;  %v522_v22 = vpop.f32.mrf.mxu1 }
  0xb7   :  { %v837_v23 = vadd.f32 %v1526_v40, %v482_v21  ;;  %v853_v24 = vadd.f32 %v1526_v40, %v522_v22 }
  0xb8   :  { %vm932_vm10 = vcmp.ge.f32.partialorder %v868_v19, 0.0  ;;  %v996_v25 = vmul.f32 0.2, %v868_v19  ;;  %vm948_vm11 = vcmp.ge.f32.partialorder %v884_v20, 0.0  ;;  %v1012_v26 = vmul.f32 0.2, %v884_v20 }
  0xb9   :  { %vm901_vm12 = vcmp.ge.f32.partialorder %v837_v23, 0.0  ;;  %v965_v27 = vmul.f32 0.2, %v837_v23  ;;  %vm917_vm13 = vcmp.ge.f32.partialorder %v853_v24, 0.0  ;;  %v981_v28 = vmul.f32 0.2, %v853_v24 }
  0xba   :  { %v1060_v29 = vsel %vm932_vm10, %v868_v19, %v996_v25  ;;  %v1076_v30 = vsel %vm948_vm11, %v884_v20, %v1012_v26 }
  0xbb   :  { %1124 = vst [vmem:[%s1787_s3 + $0x110] sm:$0xff] %v1060_v29  ;;  %v1029_v31 = vsel %vm901_vm12, %v837_v23, %v965_v27  ;;  %v1045_v32 = vsel %vm917_vm13, %v853_v24, %v981_v28 }
  0xbc   :  { %1140 = vst [vmem:[%s1787_s3 + $0x190] sm:$0xff] %v1076_v30 }
  0xbd   :  { %1093 = vst [vmem:[%s1787_s3 + $0x18] sm:$0xff] %v1029_v31  ;;  %v562_v33 = vpop.f32.mrf.mxu2  ;;  %v602_v34 = vpop.f32.mrf.mxu3 }
  0xbe   :  { %1109 = vst [vmem:[%s1787_s3 + $0x98] sm:$0xff] %v1045_v32  ;;  %v869_v35 = vadd.f32 %v1526_v40, %v562_v33  ;;  %v885_v36 = vadd.f32 %v1526_v40, %v602_v34  ;;  %v485_v37 = vpop.f32.mrf.mxu0  ;;  %v525_v38 = vpop.f32.mrf.mxu1 }
  0xbf   :  { %v838_v39 = vadd.f32 %v1526_v40, %v485_v37  ;;  %v854_v41 = vadd.f32 %v1526_v40, %v525_v38 }
  0xc0   :  { %vm933_vm14 = vcmp.ge.f32.partialorder %v869_v35, 0.0  ;;  %v997_v42 = vmul.f32 0.2, %v869_v35  ;;  %vm949_vm15 = vcmp.ge.f32.partialorder %v885_v36, 0.0  ;;  %v1013_v43 = vmul.f32 0.2, %v885_v36 }
  0xc1   :  { %vm902_vm0 = vcmp.ge.f32.partialorder %v838_v39, 0.0  ;;  %v966_v44 = vmul.f32 0.2, %v838_v39  ;;  %vm918_vm1 = vcmp.ge.f32.partialorder %v854_v41, 0.0  ;;  %v982_v45 = vmul.f32 0.2, %v854_v41 }
  0xc2   :  { %v1061_v46 = vsel %vm933_vm14, %v869_v35, %v997_v42  ;;  %v1077_v47 = vsel %vm949_vm15, %v885_v36, %v1013_v43 }
  0xc3   :  { %1125 = vst [vmem:[%s1787_s3 + $0x118] sm:$0xff] %v1061_v46  ;;  %v1030_v48 = vsel %vm902_vm0, %v838_v39, %v966_v44  ;;  %v1046_v49 = vsel %vm918_vm1, %v854_v41, %v982_v45 }
  0xc4   :  { %1141 = vst [vmem:[%s1787_s3 + $0x198] sm:$0xff] %v1077_v47 }
  0xc5   :  { %1094 = vst [vmem:[%s1787_s3 + $0x20] sm:$0xff] %v1030_v48  ;;  %v565_v50 = vpop.f32.mrf.mxu2  ;;  %v605_v51 = vpop.f32.mrf.mxu3 }
  0xc6   :  { %1110 = vst [vmem:[%s1787_s3 + $0xa0] sm:$0xff] %v1046_v49  ;;  %v870_v52 = vadd.f32 %v1526_v40, %v565_v50  ;;  %v886_v53 = vadd.f32 %v1526_v40, %v605_v51  ;;  %v487_v54 = vpop.f32.mrf.mxu0  ;;  %v527_v55 = vpop.f32.mrf.mxu1 }
  0xc7   :  { %v839_v56 = vadd.f32 %v1526_v40, %v487_v54  ;;  %v855_v57 = vadd.f32 %v1526_v40, %v527_v55 }
  0xc8   :  { %vm934_vm2 = vcmp.ge.f32.partialorder %v870_v52, 0.0  ;;  %v998_v58 = vmul.f32 0.2, %v870_v52  ;;  %vm950_vm3 = vcmp.ge.f32.partialorder %v886_v53, 0.0  ;;  %v1014_v59 = vmul.f32 0.2, %v886_v53 }
  0xc9   :  { %vm903_vm4 = vcmp.ge.f32.partialorder %v839_v56, 0.0  ;;  %v967_v60 = vmul.f32 0.2, %v839_v56  ;;  %vm919_vm5 = vcmp.ge.f32.partialorder %v855_v57, 0.0  ;;  %v983_v61 = vmul.f32 0.2, %v855_v57 }
  0xca   :  { %v1062_v62 = vsel %vm934_vm2, %v870_v52, %v998_v58  ;;  %v1078_v63 = vsel %vm950_vm3, %v886_v53, %v1014_v59 }
  0xcb   :  { %1126 = vst [vmem:[%s1787_s3 + $0x120] sm:$0xff] %v1062_v62  ;;  %v1031_v0 = vsel %vm903_vm4, %v839_v56, %v967_v60  ;;  %v1047_v1 = vsel %vm919_vm5, %v855_v57, %v983_v61 }
  0xcc   :  { %1142 = vst [vmem:[%s1787_s3 + $0x1a0] sm:$0xff] %v1078_v63 }
  0xcd   :  { %1095 = vst [vmem:[%s1787_s3 + $0x28] sm:$0xff] %v1031_v0  ;;  %v567_v2 = vpop.f32.mrf.mxu2  ;;  %v607_v3 = vpop.f32.mrf.mxu3 }
  0xce   :  { %1111 = vst [vmem:[%s1787_s3 + $0xa8] sm:$0xff] %v1047_v1  ;;  %v871_v4 = vadd.f32 %v1526_v40, %v567_v2  ;;  %v887_v5 = vadd.f32 %v1526_v40, %v607_v3  ;;  %v490_v6 = vpop.f32.mrf.mxu0  ;;  %v530_v7 = vpop.f32.mrf.mxu1 }
  0xcf   :  { %v840_v8 = vadd.f32 %v1526_v40, %v490_v6  ;;  %v856_v9 = vadd.f32 %v1526_v40, %v530_v7 }
  0xd0   :  { %vm935_vm6 = vcmp.ge.f32.partialorder %v871_v4, 0.0  ;;  %v999_v10 = vmul.f32 0.2, %v871_v4  ;;  %vm951_vm7 = vcmp.ge.f32.partialorder %v887_v5, 0.0  ;;  %v1015_v11 = vmul.f32 0.2, %v887_v5 }
  0xd1   :  { %vm904_vm8 = vcmp.ge.f32.partialorder %v840_v8, 0.0  ;;  %v968_v12 = vmul.f32 0.2, %v840_v8  ;;  %vm920_vm9 = vcmp.ge.f32.partialorder %v856_v9, 0.0  ;;  %v984_v13 = vmul.f32 0.2, %v856_v9 }
  0xd2   :  { %v1063_v14 = vsel %vm935_vm6, %v871_v4, %v999_v10  ;;  %v1079_v15 = vsel %vm951_vm7, %v887_v5, %v1015_v11 }
  0xd3   :  { %1127 = vst [vmem:[%s1787_s3 + $0x128] sm:$0xff] %v1063_v14  ;;  %v1032_v16 = vsel %vm904_vm8, %v840_v8, %v968_v12  ;;  %v1048_v17 = vsel %vm920_vm9, %v856_v9, %v984_v13 }
  0xd4   :  { %1143 = vst [vmem:[%s1787_s3 + $0x1a8] sm:$0xff] %v1079_v15 }
  0xd5   :  { %1096 = vst [vmem:[%s1787_s3 + $0x30] sm:$0xff] %v1032_v16  ;;  %v570_v18 = vpop.f32.mrf.mxu2  ;;  %v610_v19 = vpop.f32.mrf.mxu3 }
  0xd6   :  { %1112 = vst [vmem:[%s1787_s3 + $0xb0] sm:$0xff] %v1048_v17  ;;  %v872_v20 = vadd.f32 %v1526_v40, %v570_v18  ;;  %v888_v21 = vadd.f32 %v1526_v40, %v610_v19  ;;  %v492_v22 = vpop.f32.mrf.mxu0  ;;  %v532_v23 = vpop.f32.mrf.mxu1 }
  0xd7   :  { %v841_v24 = vadd.f32 %v1526_v40, %v492_v22  ;;  %v857_v25 = vadd.f32 %v1526_v40, %v532_v23 }
  0xd8   :  { %vm936_vm10 = vcmp.ge.f32.partialorder %v872_v20, 0.0  ;;  %v1000_v26 = vmul.f32 0.2, %v872_v20  ;;  %vm952_vm11 = vcmp.ge.f32.partialorder %v888_v21, 0.0  ;;  %v1016_v27 = vmul.f32 0.2, %v888_v21 }
  0xd9   :  { %vm905_vm12 = vcmp.ge.f32.partialorder %v841_v24, 0.0  ;;  %v969_v28 = vmul.f32 0.2, %v841_v24  ;;  %vm921_vm13 = vcmp.ge.f32.partialorder %v857_v25, 0.0  ;;  %v985_v29 = vmul.f32 0.2, %v857_v25 }
  0xda   :  { %v1064_v30 = vsel %vm936_vm10, %v872_v20, %v1000_v26  ;;  %v1080_v31 = vsel %vm952_vm11, %v888_v21, %v1016_v27 }
  0xdb   :  { %1128 = vst [vmem:[%s1787_s3 + $0x130] sm:$0xff] %v1064_v30  ;;  %v1033_v32 = vsel %vm905_vm12, %v841_v24, %v969_v28  ;;  %v1049_v33 = vsel %vm921_vm13, %v857_v25, %v985_v29 }
  0xdc   :  { %1144 = vst [vmem:[%s1787_s3 + $0x1b0] sm:$0xff] %v1080_v31 }
  0xdd   :  { %1097 = vst [vmem:[%s1787_s3 + $0x38] sm:$0xff] %v1033_v32  ;;  %v572_v34 = vpop.f32.mrf.mxu2  ;;  %v612_v35 = vpop.f32.mrf.mxu3 }
  0xde   :  { %1113 = vst [vmem:[%s1787_s3 + $0xb8] sm:$0xff] %v1049_v33  ;;  %v873_v36 = vadd.f32 %v1526_v40, %v572_v34  ;;  %v889_v37 = vadd.f32 %v1526_v40, %v612_v35  ;;  %v495_v38 = vpop.f32.mrf.mxu0  ;;  %v535_v39 = vpop.f32.mrf.mxu1 }
  0xdf   :  { %v842_v41 = vadd.f32 %v1526_v40, %v495_v38  ;;  %v858_v42 = vadd.f32 %v1526_v40, %v535_v39 }
  0xe0   :  { %vm937_vm14 = vcmp.ge.f32.partialorder %v873_v36, 0.0  ;;  %v1001_v43 = vmul.f32 0.2, %v873_v36  ;;  %vm953_vm15 = vcmp.ge.f32.partialorder %v889_v37, 0.0  ;;  %v1017_v44 = vmul.f32 0.2, %v889_v37 }
  0xe1   :  { %vm906_vm0 = vcmp.ge.f32.partialorder %v842_v41, 0.0  ;;  %v970_v45 = vmul.f32 0.2, %v842_v41  ;;  %vm922_vm1 = vcmp.ge.f32.partialorder %v858_v42, 0.0  ;;  %v986_v46 = vmul.f32 0.2, %v858_v42 }
  0xe2   :  { %v1065_v47 = vsel %vm937_vm14, %v873_v36, %v1001_v43  ;;  %v1081_v48 = vsel %vm953_vm15, %v889_v37, %v1017_v44 }
  0xe3   :  { %1129 = vst [vmem:[%s1787_s3 + $0x138] sm:$0xff] %v1065_v47  ;;  %v1034_v49 = vsel %vm906_vm0, %v842_v41, %v970_v45  ;;  %v1050_v50 = vsel %vm922_vm1, %v858_v42, %v986_v46 }
  0xe4   :  { %1145 = vst [vmem:[%s1787_s3 + $0x1b8] sm:$0xff] %v1081_v48 }
  0xe5   :  { %1098 = vst [vmem:[%s1787_s3 + $0x40] sm:$0xff] %v1034_v49  ;;  %v575_v51 = vpop.f32.mrf.mxu2  ;;  %v615_v52 = vpop.f32.mrf.mxu3 }
  0xe6   :  { %1114 = vst [vmem:[%s1787_s3 + $0xc0] sm:$0xff] %v1050_v50  ;;  %v874_v53 = vadd.f32 %v1526_v40, %v575_v51  ;;  %v890_v54 = vadd.f32 %v1526_v40, %v615_v52  ;;  %v497_v55 = vpop.f32.mrf.mxu0  ;;  %v537_v56 = vpop.f32.mrf.mxu1 }
  0xe7   :  { %v843_v57 = vadd.f32 %v1526_v40, %v497_v55  ;;  %v859_v58 = vadd.f32 %v1526_v40, %v537_v56 }
  0xe8   :  { %vm938_vm2 = vcmp.ge.f32.partialorder %v874_v53, 0.0  ;;  %v1002_v59 = vmul.f32 0.2, %v874_v53  ;;  %vm954_vm3 = vcmp.ge.f32.partialorder %v890_v54, 0.0  ;;  %v1018_v60 = vmul.f32 0.2, %v890_v54 }
  0xe9   :  { %vm907_vm4 = vcmp.ge.f32.partialorder %v843_v57, 0.0  ;;  %v971_v61 = vmul.f32 0.2, %v843_v57  ;;  %vm923_vm5 = vcmp.ge.f32.partialorder %v859_v58, 0.0  ;;  %v987_v62 = vmul.f32 0.2, %v859_v58 }
  0xea   :  { %v1066_v63 = vsel %vm938_vm2, %v874_v53, %v1002_v59  ;;  %v1082_v0 = vsel %vm954_vm3, %v890_v54, %v1018_v60 }
  0xeb   :  { %1130 = vst [vmem:[%s1787_s3 + $0x140] sm:$0xff] %v1066_v63  ;;  %v1035_v1 = vsel %vm907_vm4, %v843_v57, %v971_v61  ;;  %v1051_v2 = vsel %vm923_vm5, %v859_v58, %v987_v62 }
  0xec   :  { %1146 = vst [vmem:[%s1787_s3 + $0x1c0] sm:$0xff] %v1082_v0 }
  0xed   :  { %1099 = vst [vmem:[%s1787_s3 + $0x48] sm:$0xff] %v1035_v1  ;;  %v577_v3 = vpop.f32.mrf.mxu2  ;;  %v617_v4 = vpop.f32.mrf.mxu3 }
  0xee   :  { %1115 = vst [vmem:[%s1787_s3 + $0xc8] sm:$0xff] %v1051_v2  ;;  %v875_v5 = vadd.f32 %v1526_v40, %v577_v3  ;;  %v891_v6 = vadd.f32 %v1526_v40, %v617_v4  ;;  %v500_v7 = vpop.f32.mrf.mxu0  ;;  %v540_v8 = vpop.f32.mrf.mxu1 }
  0xef   :  { %v844_v9 = vadd.f32 %v1526_v40, %v500_v7  ;;  %v860_v10 = vadd.f32 %v1526_v40, %v540_v8 }
  0xf0   :  { %vm939_vm6 = vcmp.ge.f32.partialorder %v875_v5, 0.0  ;;  %v1003_v11 = vmul.f32 0.2, %v875_v5  ;;  %vm955_vm7 = vcmp.ge.f32.partialorder %v891_v6, 0.0  ;;  %v1019_v12 = vmul.f32 0.2, %v891_v6 }
  0xf1   :  { %vm908_vm8 = vcmp.ge.f32.partialorder %v844_v9, 0.0  ;;  %v972_v13 = vmul.f32 0.2, %v844_v9  ;;  %vm924_vm9 = vcmp.ge.f32.partialorder %v860_v10, 0.0  ;;  %v988_v14 = vmul.f32 0.2, %v860_v10 }
  0xf2   :  { %v1067_v15 = vsel %vm939_vm6, %v875_v5, %v1003_v11  ;;  %v1083_v16 = vsel %vm955_vm7, %v891_v6, %v1019_v12 }
  0xf3   :  { %1131 = vst [vmem:[%s1787_s3 + $0x148] sm:$0xff] %v1067_v15  ;;  %v1036_v17 = vsel %vm908_vm8, %v844_v9, %v972_v13  ;;  %v1052_v18 = vsel %vm924_vm9, %v860_v10, %v988_v14 }
  0xf4   :  { %1147 = vst [vmem:[%s1787_s3 + $0x1c8] sm:$0xff] %v1083_v16 }
  0xf5   :  { %1100 = vst [vmem:[%s1787_s3 + $0x50] sm:$0xff] %v1036_v17  ;;  %v580_v19 = vpop.f32.mrf.mxu2  ;;  %v620_v20 = vpop.f32.mrf.mxu3 }
  0xf6   :  { %1116 = vst [vmem:[%s1787_s3 + $0xd0] sm:$0xff] %v1052_v18  ;;  %v876_v21 = vadd.f32 %v1526_v40, %v580_v19  ;;  %v892_v22 = vadd.f32 %v1526_v40, %v620_v20  ;;  %v502_v23 = vpop.f32.mrf.mxu0  ;;  %v542_v24 = vpop.f32.mrf.mxu1 }
  0xf7   :  { %v845_v25 = vadd.f32 %v1526_v40, %v502_v23  ;;  %v861_v26 = vadd.f32 %v1526_v40, %v542_v24 }
  0xf8   :  { %vm940_vm10 = vcmp.ge.f32.partialorder %v876_v21, 0.0  ;;  %v1004_v27 = vmul.f32 0.2, %v876_v21  ;;  %vm956_vm11 = vcmp.ge.f32.partialorder %v892_v22, 0.0  ;;  %v1020_v28 = vmul.f32 0.2, %v892_v22 }
  0xf9   :  { %vm909_vm12 = vcmp.ge.f32.partialorder %v845_v25, 0.0  ;;  %v973_v29 = vmul.f32 0.2, %v845_v25  ;;  %vm925_vm13 = vcmp.ge.f32.partialorder %v861_v26, 0.0  ;;  %v989_v30 = vmul.f32 0.2, %v861_v26 }
  0xfa   :  { %v1068_v31 = vsel %vm940_vm10, %v876_v21, %v1004_v27  ;;  %v1084_v32 = vsel %vm956_vm11, %v892_v22, %v1020_v28 }
  0xfb   :  { %1132 = vst [vmem:[%s1787_s3 + $0x150] sm:$0xff] %v1068_v31  ;;  %v1037_v33 = vsel %vm909_vm12, %v845_v25, %v973_v29  ;;  %v1053_v34 = vsel %vm925_vm13, %v861_v26, %v989_v30 }
  0xfc   :  { %1148 = vst [vmem:[%s1787_s3 + $0x1d0] sm:$0xff] %v1084_v32 }
  0xfd   :  { %1101 = vst [vmem:[%s1787_s3 + $0x58] sm:$0xff] %v1037_v33  ;;  %v582_v35 = vpop.f32.mrf.mxu2  ;;  %v622_v36 = vpop.f32.mrf.mxu3 }
  0xfe   :  { %1117 = vst [vmem:[%s1787_s3 + $0xd8] sm:$0xff] %v1053_v34  ;;  %v877_v37 = vadd.f32 %v1526_v40, %v582_v35  ;;  %v893_v38 = vadd.f32 %v1526_v40, %v622_v36  ;;  %v505_v39 = vpop.f32.mrf.mxu0  ;;  %v545_v41 = vpop.f32.mrf.mxu1 }
  0xff   :  { %v846_v42 = vadd.f32 %v1526_v40, %v505_v39  ;;  %v862_v43 = vadd.f32 %v1526_v40, %v545_v41 }
 0x100   :  { %vm941_vm14 = vcmp.ge.f32.partialorder %v877_v37, 0.0  ;;  %v1005_v44 = vmul.f32 0.2, %v877_v37  ;;  %vm957_vm15 = vcmp.ge.f32.partialorder %v893_v38, 0.0  ;;  %v1021_v45 = vmul.f32 0.2, %v893_v38 }
 0x101   :  { %vm910_vm0 = vcmp.ge.f32.partialorder %v846_v42, 0.0  ;;  %v974_v46 = vmul.f32 0.2, %v846_v42  ;;  %vm926_vm1 = vcmp.ge.f32.partialorder %v862_v43, 0.0  ;;  %v990_v47 = vmul.f32 0.2, %v862_v43 }
 0x102   :  { %v1069_v48 = vsel %vm941_vm14, %v877_v37, %v1005_v44  ;;  %v1085_v49 = vsel %vm957_vm15, %v893_v38, %v1021_v45 }
 0x103   :  { %1133 = vst [vmem:[%s1787_s3 + $0x158] sm:$0xff] %v1069_v48  ;;  %v1038_v50 = vsel %vm910_vm0, %v846_v42, %v974_v46  ;;  %v1054_v51 = vsel %vm926_vm1, %v862_v43, %v990_v47 }
 0x104   :  { %1149 = vst [vmem:[%s1787_s3 + $0x1d8] sm:$0xff] %v1085_v49 }
 0x105   :  { %1102 = vst [vmem:[%s1787_s3 + $0x60] sm:$0xff] %v1038_v50  ;;  %v585_v52 = vpop.f32.mrf.mxu2  ;;  %v625_v53 = vpop.f32.mrf.mxu3 }
 0x106   :  { %1118 = vst [vmem:[%s1787_s3 + $0xe0] sm:$0xff] %v1054_v51  ;;  %v878_v54 = vadd.f32 %v1526_v40, %v585_v52  ;;  %v894_v55 = vadd.f32 %v1526_v40, %v625_v53  ;;  %v507_v56 = vpop.f32.mrf.mxu0  ;;  %v547_v57 = vpop.f32.mrf.mxu1 }
 0x107   :  { %v847_v58 = vadd.f32 %v1526_v40, %v507_v56  ;;  %v863_v59 = vadd.f32 %v1526_v40, %v547_v57 }
 0x108   :  { %vm942_vm2 = vcmp.ge.f32.partialorder %v878_v54, 0.0  ;;  %v1006_v60 = vmul.f32 0.2, %v878_v54  ;;  %vm958_vm3 = vcmp.ge.f32.partialorder %v894_v55, 0.0  ;;  %v1022_v61 = vmul.f32 0.2, %v894_v55 }
 0x109   :  { %vm911_vm4 = vcmp.ge.f32.partialorder %v847_v58, 0.0  ;;  %v975_v62 = vmul.f32 0.2, %v847_v58  ;;  %vm927_vm5 = vcmp.ge.f32.partialorder %v863_v59, 0.0  ;;  %v991_v63 = vmul.f32 0.2, %v863_v59 }
 0x10a   :  { %v1070_v0 = vsel %vm942_vm2, %v878_v54, %v1006_v60  ;;  %v1086_v1 = vsel %vm958_vm3, %v894_v55, %v1022_v61 }
 0x10b   :  { %1134 = vst [vmem:[%s1787_s3 + $0x160] sm:$0xff] %v1070_v0  ;;  %v1039_v2 = vsel %vm911_vm4, %v847_v58, %v975_v62  ;;  %v1055_v3 = vsel %vm927_vm5, %v863_v59, %v991_v63 }
 0x10c   :  { %1150 = vst [vmem:[%s1787_s3 + $0x1e0] sm:$0xff] %v1086_v1 }
 0x10d   :  { %1103 = vst [vmem:[%s1787_s3 + $0x68] sm:$0xff] %v1039_v2  ;;  %v587_v4 = vpop.f32.mrf.mxu2  ;;  %v627_v5 = vpop.f32.mrf.mxu3 }
 0x10e   :  { %1119 = vst [vmem:[%s1787_s3 + $0xe8] sm:$0xff] %v1055_v3  ;;  %v879_v6 = vadd.f32 %v1526_v40, %v587_v4  ;;  %v895_v7 = vadd.f32 %v1526_v40, %v627_v5  ;;  %v510_v8 = vpop.f32.mrf.mxu0  ;;  %v550_v9 = vpop.f32.mrf.mxu1 }
 0x10f   :  { %v848_v10 = vadd.f32 %v1526_v40, %v510_v8  ;;  %v864_v11 = vadd.f32 %v1526_v40, %v550_v9 }
 0x110   :  { %vm943_vm6 = vcmp.ge.f32.partialorder %v879_v6, 0.0  ;;  %v1007_v12 = vmul.f32 0.2, %v879_v6  ;;  %vm959_vm7 = vcmp.ge.f32.partialorder %v895_v7, 0.0  ;;  %v1023_v13 = vmul.f32 0.2, %v895_v7 }
 0x111   :  { %vm912_vm8 = vcmp.ge.f32.partialorder %v848_v10, 0.0  ;;  %v976_v14 = vmul.f32 0.2, %v848_v10  ;;  %vm928_vm9 = vcmp.ge.f32.partialorder %v864_v11, 0.0  ;;  %v992_v15 = vmul.f32 0.2, %v864_v11 }
 0x112   :  { %v1071_v16 = vsel %vm943_vm6, %v879_v6, %v1007_v12  ;;  %v1087_v17 = vsel %vm959_vm7, %v895_v7, %v1023_v13 }
 0x113   :  { %1135 = vst [vmem:[%s1787_s3 + $0x168] sm:$0xff] %v1071_v16  ;;  %v1040_v18 = vsel %vm912_vm8, %v848_v10, %v976_v14  ;;  %v1056_v19 = vsel %vm928_vm9, %v864_v11, %v992_v15 }
 0x114   :  { %1151 = vst [vmem:[%s1787_s3 + $0x1e8] sm:$0xff] %v1087_v17 }
 0x115   :  { %1104 = vst [vmem:[%s1787_s3 + $0x70] sm:$0xff] %v1040_v18  ;;  %v590_v20 = vpop.f32.mrf.mxu2  ;;  %v630_v21 = vpop.f32.mrf.mxu3 }
 0x116   :  { %1120 = vst [vmem:[%s1787_s3 + $0xf0] sm:$0xff] %v1056_v19  ;;  %v880_v22 = vadd.f32 %v1526_v40, %v590_v20  ;;  %v896_v23 = vadd.f32 %v1526_v40, %v630_v21  ;;  %v512_v24 = vpop.f32.mrf.mxu0  ;;  %v552_v25 = vpop.f32.mrf.mxu1 }
 0x117   :  { %v849_v26 = vadd.f32 %v1526_v40, %v512_v24  ;;  %v865_v27 = vadd.f32 %v1526_v40, %v552_v25 }
 0x118   :  { %vm944_vm10 = vcmp.ge.f32.partialorder %v880_v22, 0.0  ;;  %v1008_v28 = vmul.f32 0.2, %v880_v22  ;;  %vm960_vm11 = vcmp.ge.f32.partialorder %v896_v23, 0.0  ;;  %v1024_v29 = vmul.f32 0.2, %v896_v23 }
 0x119   :  { %vm913_vm12 = vcmp.ge.f32.partialorder %v849_v26, 0.0  ;;  %v977_v30 = vmul.f32 0.2, %v849_v26  ;;  %vm929_vm13 = vcmp.ge.f32.partialorder %v865_v27, 0.0  ;;  %v993_v31 = vmul.f32 0.2, %v865_v27 }
 0x11a   :  { %v1072_v32 = vsel %vm944_vm10, %v880_v22, %v1008_v28  ;;  %v1088_v33 = vsel %vm960_vm11, %v896_v23, %v1024_v29 }
 0x11b   :  { %1136 = vst [vmem:[%s1787_s3 + $0x170] sm:$0xff] %v1072_v32  ;;  %v1041_v34 = vsel %vm913_vm12, %v849_v26, %v977_v30  ;;  %v1057_v35 = vsel %vm929_vm13, %v865_v27, %v993_v31 }
 0x11c   :  { %1152 = vst [vmem:[%s1787_s3 + $0x1f0] sm:$0xff] %v1088_v33 }
 0x11d   :  { %1105 = vst [vmem:[%s1787_s3 + $0x78] sm:$0xff] %v1041_v34  ;;  %v592_v36 = vpop.f32.mrf.mxu2  ;;  %v632_v37 = vpop.f32.mrf.mxu3 }
 0x11e   :  { %1121 = vst [vmem:[%s1787_s3 + $0xf8] sm:$0xff] %v1057_v35  ;;  %v881_v38 = vadd.f32 %v1526_v40, %v592_v36  ;;  %v897_v39 = vadd.f32 %v1526_v40, %v632_v37 }
 0x120   :  { %vm945_vm14 = vcmp.ge.f32.partialorder %v881_v38, 0.0  ;;  %v1009_v41 = vmul.f32 0.2, %v881_v38  ;;  %vm961_vm15 = vcmp.ge.f32.partialorder %v897_v39, 0.0  ;;  %v1025_v42 = vmul.f32 0.2, %v897_v39 }
 0x122   :  { %v1073_v43 = vsel %vm945_vm14, %v881_v38, %v1009_v41  ;;  %v1089_v44 = vsel %vm961_vm15, %v897_v39, %v1025_v42 }
 0x123   :  { %1137 = vst [vmem:[%s1787_s3 + $0x178] sm:$0xff] %v1073_v43 }
 0x124   :  { %1153 = vst [vmem:[%s1787_s3 + $0x1f8] sm:$0xff] %v1089_v44 }

// kernel: nlayer_discriminator_forward.12
= control target key start
LH: loop header
LB: loop body
LE: loop exit
PB: predicated region body
PF: predicated region fallthrough
CT: control target
= control target key end

     0   :  { %s542_s1 = inlined_call_operand.vmem [shape: bf16[128,128], index: 1, kind: input, shape index: {}]   ;;  %s543_s2 = inlined_call_operand.vmem [shape: f32[1,128], index: 2, kind: input, shape index: {}]   ;;  %s544_s0 = inlined_call_operand.vmem [shape: bf16[128,128], index: 0, kind: input, shape index: {}]   ;;  %s545_s3 = inlined_call_operand.vmem [shape: f32[128,128], index: 3, kind: output, shape index: {}]  }
   0x1   :  { %v397_v0 = vld [vmem:[%s542_s1 + $0x38] sm:$0xff]  ;;  %v396_v1 = vld [vmem:[%s542_s1 + $0x30] sm:$0xff]  ;;  %v395_v2 = vld [vmem:[%s542_s1 + $0x28] sm:$0xff] }
   0x2   :  { %178 = vmatpush.bf16.msra.mxu0 %v397_v0  ;;  %398 = vmatpush.bf16.msra.mxu1 %v397_v0  ;;  %v394_v3 = vld [vmem:[%s542_s1 + $0x20] sm:$0xff]  ;;  %v393_v4 = vld [vmem:[%s542_s1 + $0x18] sm:$0xff]  ;;  %v392_v5 = vld [vmem:[%s542_s1 + $0x10] sm:$0xff] }
   0x3   :  { %399 = vmatpush.bf16.msra.mxu2 %v397_v0  ;;  %400 = vmatpush.bf16.msra.mxu3 %v397_v0  ;;  %v391_v6 = vld [vmem:[%s542_s1 + $0x8] sm:$0xff]  ;;  %v390_v7 = vld [vmem:[%s542_s1] sm:$0xff]  ;;  %v384_v9 = vld [vmem:[%s544_s0 + $0x10] sm:$0xff] }
   0x4   :  { %v382_v8 = vld [vmem:[%s544_s0] sm:$0xff]  ;;  %v388_v11 = vld [vmem:[%s544_s0 + $0x30] sm:$0xff]  ;;  %v383_v12 = vld [vmem:[%s544_s0 + $0x8] sm:$0xff] }
   0x5   :  { %v386_v10 = vld [vmem:[%s544_s0 + $0x20] sm:$0xff]  ;;  %v385_v13 = vld [vmem:[%s544_s0 + $0x18] sm:$0xff]  ;;  %v387_v14 = vld [vmem:[%s544_s0 + $0x28] sm:$0xff] }
   0x6   :  { %179 = vmatpush.bf16.msra.mxu0 %v396_v1  ;;  %401 = vmatpush.bf16.msra.mxu1 %v396_v1  ;;  %v389_v15 = vld [vmem:[%s544_s0 + $0x38] sm:$0xff]  ;;  %v422_v16 = vld [vmem:[%s543_s2] ss:$0 sm:$0xff] }
   0x7   :  { %402 = vmatpush.bf16.msra.mxu2 %v396_v1  ;;  %403 = vmatpush.bf16.msra.mxu3 %v396_v1 }
   0xa   :  { %180 = vmatpush.bf16.msra.mxu0 %v395_v2  ;;  %404 = vmatpush.bf16.msra.mxu1 %v395_v2 }
   0xb   :  { %405 = vmatpush.bf16.msra.mxu2 %v395_v2  ;;  %406 = vmatpush.bf16.msra.mxu3 %v395_v2 }
   0xe   :  { %181 = vmatpush.bf16.msra.mxu0 %v394_v3  ;;  %407 = vmatpush.bf16.msra.mxu1 %v394_v3 }
   0xf   :  { %408 = vmatpush.bf16.msra.mxu2 %v394_v3  ;;  %409 = vmatpush.bf16.msra.mxu3 %v394_v3 }
  0x12   :  { %182 = vmatpush.bf16.msra.mxu0 %v393_v4  ;;  %410 = vmatpush.bf16.msra.mxu1 %v393_v4 }
  0x13   :  { %411 = vmatpush.bf16.msra.mxu2 %v393_v4  ;;  %412 = vmatpush.bf16.msra.mxu3 %v393_v4 }
  0x16   :  { %183 = vmatpush.bf16.msra.mxu0 %v392_v5  ;;  %413 = vmatpush.bf16.msra.mxu1 %v392_v5 }
  0x17   :  { %414 = vmatpush.bf16.msra.mxu2 %v392_v5  ;;  %415 = vmatpush.bf16.msra.mxu3 %v392_v5 }
  0x1a   :  { %184 = vmatpush.bf16.msra.mxu0 %v391_v6  ;;  %416 = vmatpush.bf16.msra.mxu1 %v391_v6 }
  0x1b   :  { %417 = vmatpush.bf16.msra.mxu2 %v391_v6  ;;  %418 = vmatpush.bf16.msra.mxu3 %v391_v6 }
  0x1e   :  { %185 = vmatpush.bf16.msra.mxu0 %v390_v7  ;;  %419 = vmatpush.bf16.msra.mxu1 %v390_v7 }
  0x1f   :  { %420 = vmatpush.bf16.msra.mxu2 %v390_v7  ;;  %421 = vmatpush.bf16.msra.mxu3 %v390_v7 }
  0x21   :  { %186 = vmatmul.bf16.vlgmr.msra.gmra.mxu0 %v382_v8  ;;  %196 = vmatmul.bf16.vlgmr.msra.gmra.mxu1 %v384_v9 }
  0x22   :  { %206 = vmatmul.bf16.vlgmr.msra.gmra.mxu2 %v386_v10  ;;  %216 = vmatmul.bf16.vlgmr.msra.gmra.mxu3 %v388_v11 }
  0x31   :  { %191 = vmatmul.bf16.gmra.mxu0 %v383_v12  ;;  %201 = vmatmul.bf16.gmra.mxu1 %v385_v13 }
  0x32   :  { %211 = vmatmul.bf16.gmra.mxu2 %v387_v14  ;;  %221 = vmatmul.bf16.gmra.mxu3 %v389_v15 }
  0x9e   :  { %v187_v17 = vpop.f32.mrf.mxu0  ;;  %v197_v18 = vpop.f32.mrf.mxu1 }
  0x9f   :  { %v282_v19 = vadd.f32 %v422_v16, %v187_v17  ;;  %v286_v20 = vadd.f32 %v422_v16, %v197_v18 }
  0xa1   :  { %298 = vst [vmem:[%s545_s3] sm:$0xff] %v282_v19 }
  0xa2   :  { %302 = vst [vmem:[%s545_s3 + $0x20] sm:$0xff] %v286_v20 }
  0xa5   :  { %v207_v21 = vpop.f32.mrf.mxu2  ;;  %v217_v22 = vpop.f32.mrf.mxu3 }
  0xa6   :  { %v290_v23 = vadd.f32 %v422_v16, %v207_v21  ;;  %v294_v24 = vadd.f32 %v422_v16, %v217_v22  ;;  %v189_v25 = vpop.f32.mrf.mxu0  ;;  %v199_v26 = vpop.f32.mrf.mxu1 }
  0xa7   :  { %v283_v27 = vadd.f32 %v422_v16, %v189_v25  ;;  %v287_v28 = vadd.f32 %v422_v16, %v199_v26 }
  0xa8   :  { %306 = vst [vmem:[%s545_s3 + $0x40] sm:$0xff] %v290_v23 }
  0xa9   :  { %310 = vst [vmem:[%s545_s3 + $0x60] sm:$0xff] %v294_v24 }
  0xaa   :  { %299 = vst [vmem:[%s545_s3 + $0x8] sm:$0xff] %v283_v27 }
  0xab   :  { %303 = vst [vmem:[%s545_s3 + $0x28] sm:$0xff] %v287_v28 }
  0xad   :  { %v209_v29 = vpop.f32.mrf.mxu2  ;;  %v219_v30 = vpop.f32.mrf.mxu3 }
  0xae   :  { %v291_v31 = vadd.f32 %v422_v16, %v209_v29  ;;  %v295_v32 = vadd.f32 %v422_v16, %v219_v30  ;;  %v192_v33 = vpop.f32.mrf.mxu0  ;;  %v202_v34 = vpop.f32.mrf.mxu1 }
  0xaf   :  { %v284_v35 = vadd.f32 %v422_v16, %v192_v33  ;;  %v288_v36 = vadd.f32 %v422_v16, %v202_v34 }
  0xb0   :  { %307 = vst [vmem:[%s545_s3 + $0x48] sm:$0xff] %v291_v31 }
  0xb1   :  { %311 = vst [vmem:[%s545_s3 + $0x68] sm:$0xff] %v295_v32 }
  0xb2   :  { %300 = vst [vmem:[%s545_s3 + $0x10] sm:$0xff] %v284_v35 }
  0xb3   :  { %304 = vst [vmem:[%s545_s3 + $0x30] sm:$0xff] %v288_v36 }
  0xb5   :  { %v212_v37 = vpop.f32.mrf.mxu2  ;;  %v222_v38 = vpop.f32.mrf.mxu3 }
  0xb6   :  { %v292_v39 = vadd.f32 %v422_v16, %v212_v37  ;;  %v296_v40 = vadd.f32 %v422_v16, %v222_v38  ;;  %v194_v41 = vpop.f32.mrf.mxu0  ;;  %v204_v42 = vpop.f32.mrf.mxu1 }
  0xb7   :  { %v285_v43 = vadd.f32 %v422_v16, %v194_v41  ;;  %v289_v44 = vadd.f32 %v422_v16, %v204_v42 }
  0xb8   :  { %308 = vst [vmem:[%s545_s3 + $0x50] sm:$0xff] %v292_v39 }
  0xb9   :  { %312 = vst [vmem:[%s545_s3 + $0x70] sm:$0xff] %v296_v40 }
  0xba   :  { %301 = vst [vmem:[%s545_s3 + $0x18] sm:$0xff] %v285_v43 }
  0xbb   :  { %305 = vst [vmem:[%s545_s3 + $0x38] sm:$0xff] %v289_v44 }
  0xbd   :  { %v214_v45 = vpop.f32.mrf.mxu2  ;;  %v224_v46 = vpop.f32.mrf.mxu3 }
  0xbe   :  { %v293_v47 = vadd.f32 %v422_v16, %v214_v45  ;;  %v297_v48 = vadd.f32 %v422_v16, %v224_v46 }
  0xc0   :  { %309 = vst [vmem:[%s545_s3 + $0x58] sm:$0xff] %v293_v47 }
  0xc1   :  { %313 = vst [vmem:[%s545_s3 + $0x78] sm:$0xff] %v297_v48 }

// kernel: nlayer_discriminator_forward.13
= control target key start
LH: loop header
LB: loop body
LE: loop exit
PB: predicated region body
PF: predicated region fallthrough
CT: control target
= control target key end

     0   :  { %v105_v0 = vmov 0.0   ;;  %s187_s1 = inlined_call_operand.vmem [shape: f32[1,128], index: 1, kind: output, shape index: {0}]   ;;  %s188_s2 = inlined_call_operand.vmem [shape: f32[1,128], index: 2, kind: output, shape index: {1}]   ;;  %s189_s0 = inlined_call_operand.vmem [shape: f32[128,128], index: 0, kind: input, shape index: {}]  }
   0x1   :  { %14 = vst [vmem:[%s187_s1] sm:$0x1] %v105_v0  ;;  %v16_v1 = vld [vmem:[%s189_s0] sm:$0xff]  ;;  %v17_v2 = vld [vmem:[%s189_s0 + $0x8] sm:$0xff]  ;;  %v18_v3 = vld [vmem:[%s189_s0 + $0x10] sm:$0xff] }
   0x2   :  { %15 = vst [vmem:[%s188_s2] sm:$0x1] %v105_v0  ;;  %v19_v4 = vld [vmem:[%s189_s0 + $0x18] sm:$0xff]  ;;  %v33_v5 = vadd.f32 %v17_v2, %v16_v1  ;;  %v57_v6 = vmul.f32 %v16_v1, %v16_v1  ;;  %v58_v7 = vmul.f32 %v17_v2, %v17_v2  ;;  %v59_v8 = vmul.f32 %v18_v3, %v18_v3  ;;  %v20_v9 = vld [vmem:[%s189_s0 + $0x20] sm:$0xff]  ;;  %v21_v13 = vld [vmem:[%s189_s0 + $0x28] sm:$0xff] }
   0x3   :  { %v60_v11 = vmul.f32 %v19_v4, %v19_v4  ;;  %v61_v15 = vmul.f32 %v20_v9, %v20_v9  ;;  %v22_v17 = vld [vmem:[%s189_s0 + $0x30] sm:$0xff]  ;;  %v62_v19 = vmul.f32 %v21_v13, %v21_v13  ;;  %v23_v21 = vld [vmem:[%s189_s0 + $0x38] sm:$0xff]  ;;  %v24_v25 = vld [vmem:[%s189_s0 + $0x40] sm:$0xff] }
   0x4   :  { %v34_v10 = vadd.f32 %v33_v5, %v18_v3  ;;  %v73_v12 = vadd.f32 %v58_v7, %v57_v6  ;;  %v63_v23 = vmul.f32 %v22_v17, %v22_v17  ;;  %v64_v27 = vmul.f32 %v23_v21, %v23_v21  ;;  %v25_v29 = vld [vmem:[%s189_s0 + $0x48] sm:$0xff]  ;;  %v26_v33 = vld [vmem:[%s189_s0 + $0x50] sm:$0xff]  ;;  %v27_v37 = vld [vmem:[%s189_s0 + $0x58] sm:$0xff] }
   0x5   :  { %v65_v31 = vmul.f32 %v24_v25, %v24_v25  ;;  %v66_v35 = vmul.f32 %v25_v29, %v25_v29  ;;  %v67_v39 = vmul.f32 %v26_v33, %v26_v33  ;;  %v28_v41 = vld [vmem:[%s189_s0 + $0x60] sm:$0xff]  ;;  %v68_v43 = vmul.f32 %v27_v37, %v27_v37  ;;  %v29_v45 = vld [vmem:[%s189_s0 + $0x68] sm:$0xff]  ;;  %v30_v49 = vld [vmem:[%s189_s0 + $0x70] sm:$0xff] }
   0x6   :  { %v35_v14 = vadd.f32 %v34_v10, %v19_v4  ;;  %v74_v16 = vadd.f32 %v73_v12, %v59_v8  ;;  %v69_v47 = vmul.f32 %v28_v41, %v28_v41  ;;  %v70_v51 = vmul.f32 %v29_v45, %v29_v45  ;;  %v31_v53 = vld [vmem:[%s189_s0 + $0x78] sm:$0xff] }
   0x7   :  { %v71_v55 = vmul.f32 %v30_v49, %v30_v49  ;;  %v72_v58 = vmul.f32 %v31_v53, %v31_v53 }
   0x8   :  { %v36_v18 = vadd.f32 %v35_v14, %v20_v9  ;;  %v75_v20 = vadd.f32 %v74_v16, %v60_v11  ;;  %v32_v7 = vld [vmem:[%s187_s1] sm:$0x1] }
   0x9   :  { %v56_v12 = vld [vmem:[%s188_s2] sm:$0x1] }
   0xa   :  { %v37_v22 = vadd.f32 %v36_v18, %v21_v13  ;;  %v76_v24 = vadd.f32 %v75_v20, %v61_v15 }
   0xc   :  { %v38_v26 = vadd.f32 %v37_v22, %v22_v17  ;;  %v77_v28 = vadd.f32 %v76_v24, %v62_v19 }
   0xe   :  { %v39_v30 = vadd.f32 %v38_v26, %v23_v21  ;;  %v78_v32 = vadd.f32 %v77_v28, %v63_v23 }
  0x10   :  { %v40_v34 = vadd.f32 %v39_v30, %v24_v25  ;;  %v79_v36 = vadd.f32 %v78_v32, %v64_v27 }
  0x12   :  { %v41_v38 = vadd.f32 %v40_v34, %v25_v29  ;;  %v80_v40 = vadd.f32 %v79_v36, %v65_v31 }
  0x14   :  { %v42_v42 = vadd.f32 %v41_v38, %v26_v33  ;;  %v81_v44 = vadd.f32 %v80_v40, %v66_v35 }
  0x16   :  { %v43_v46 = vadd.f32 %v42_v42, %v27_v37  ;;  %v82_v48 = vadd.f32 %v81_v44, %v67_v39 }
  0x18   :  { %v44_v50 = vadd.f32 %v43_v46, %v28_v41  ;;  %v83_v52 = vadd.f32 %v82_v48, %v68_v43 }
  0x1a   :  { %v45_v54 = vadd.f32 %v44_v50, %v29_v45  ;;  %v84_v56 = vadd.f32 %v83_v52, %v69_v47 }
  0x1c   :  { %v46_v57 = vadd.f32 %v45_v54, %v30_v49  ;;  %v85_v59 = vadd.f32 %v84_v56, %v70_v51 }
  0x1e   :  { %v47_v60 = vadd.f32 %v46_v57, %v31_v53  ;;  %v86_v61 = vadd.f32 %v85_v59, %v71_v55 }
  0x20   :  { %v48_v62 = vrot.slane %v47_v60, 4  ;;  %v87_v63 = vadd.f32 %v86_v61, %v72_v58 }
  0x22   :  { %v49_v0 = vadd.f32 %v48_v62, %v47_v60  ;;  %v88_v1 = vrot.slane %v87_v63, 4 }
  0x24   :  { %v50_v2 = vrot.slane %v49_v0, 2  ;;  %v89_v3 = vadd.f32 %v88_v1, %v87_v63 }
  0x26   :  { %v51_v4 = vadd.f32 %v50_v2, %v49_v0  ;;  %v90_v5 = vrot.slane %v89_v3, 2 }
  0x28   :  { %v52_v6 = vrot.slane %v51_v4, 1  ;;  %v91_v8 = vadd.f32 %v90_v5, %v89_v3 }
  0x2a   :  { %v53_v9 = vadd.f32 %v52_v6, %v51_v4  ;;  %v92_v10 = vrot.slane %v91_v8, 1 }
  0x2c   :  { %v54_v11 = vadd.f32 %v53_v9, %v32_v7  ;;  %v93_v13 = vadd.f32 %v92_v10, %v91_v8 }
  0x2e   :  { %55 = vst [vmem:[%s187_s1] sm:$0x1] %v54_v11  ;;  %v94_v14 = vadd.f32 %v93_v13, %v56_v12 }
  0x30   :  { %95 = vst [vmem:[%s188_s2] sm:$0x1] %v94_v14 }

// kernel: nlayer_discriminator_forward.14
= control target key start
LH: loop header
LB: loop body
LE: loop exit
PB: predicated region body
PF: predicated region fallthrough
CT: control target
= control target key end

     0   :  { %s298_s0 = inlined_call_operand.vmem [shape: f32[128,128], index: 0, kind: input, shape index: {}]   ;;  %s299_s1 = inlined_call_operand.vmem [shape: f32[1,128], index: 1, kind: input, shape index: {}]   ;;  %s300_s2 = inlined_call_operand.vmem [shape: f32[1,128], index: 2, kind: input, shape index: {}]   ;;  %s301_s3 = inlined_call_operand.vmem [shape: f32[128,128], index: 3, kind: output, shape index: {}]  }
   0x1   :  { %v14_v0 = vld [vmem:[%s298_s0] sm:$0xff]  ;;  %v15_v3 = vld [vmem:[%s298_s0 + $0x8] sm:$0xff]  ;;  %v16_v6 = vld [vmem:[%s298_s0 + $0x10] sm:$0xff] }
   0x2   :  { %v166_v1 = vld [vmem:[%s299_s1] ss:$0 sm:$0xff]  ;;  %v17_v7 = vld [vmem:[%s298_s0 + $0x18] sm:$0xff]  ;;  %v19_v12 = vld [vmem:[%s298_s0 + $0x28] sm:$0xff] }
   0x3   :  { %v171_v2 = vld [vmem:[%s300_s2] ss:$0 sm:$0xff]  ;;  %v34_v4 = vmul.f32 %v166_v1, %v14_v0  ;;  %v35_v5 = vmul.f32 %v166_v1, %v15_v3  ;;  %v36_v9 = vmul.f32 %v166_v1, %v16_v6  ;;  %v37_v10 = vmul.f32 %v166_v1, %v17_v7  ;;  %v20_v13 = vld [vmem:[%s298_s0 + $0x30] sm:$0xff]  ;;  %v21_v14 = vld [vmem:[%s298_s0 + $0x38] sm:$0xff] }
   0x4   :  { %v18_v8 = vld [vmem:[%s298_s0 + $0x20] sm:$0xff]  ;;  %v39_v17 = vmul.f32 %v166_v1, %v19_v12  ;;  %v40_v18 = vmul.f32 %v166_v1, %v20_v13  ;;  %v41_v22 = vmul.f32 %v166_v1, %v21_v14  ;;  %v23_v24 = vld [vmem:[%s298_s0 + $0x48] sm:$0xff]  ;;  %v24_v32 = vld [vmem:[%s298_s0 + $0x50] sm:$0xff] }
   0x5   :  { %v38_v11 = vmul.f32 %v166_v1, %v18_v8  ;;  %v54_v15 = vadd.f32 %v171_v2, %v34_v4  ;;  %v55_v16 = vadd.f32 %v171_v2, %v35_v5  ;;  %v56_v19 = vadd.f32 %v171_v2, %v36_v9  ;;  %v22_v23 = vld [vmem:[%s298_s0 + $0x40] sm:$0xff]  ;;  %v25_v41 = vld [vmem:[%s298_s0 + $0x58] sm:$0xff]  ;;  %v27_v52 = vld [vmem:[%s298_s0 + $0x68] sm:$0xff] }
   0x6   :  { %v57_v20 = vadd.f32 %v171_v2, %v37_v10  ;;  %v59_v35 = vadd.f32 %v171_v2, %v39_v17  ;;  %v60_v36 = vadd.f32 %v171_v2, %v40_v18  ;;  %v61_v38 = vadd.f32 %v171_v2, %v41_v22  ;;  %v26_v51 = vld [vmem:[%s298_s0 + $0x60] sm:$0xff]  ;;  %v28_v56 = vld [vmem:[%s298_s0 + $0x70] sm:$0xff]  ;;  %v29_v59 = vld [vmem:[%s298_s0 + $0x78] sm:$0xff] }
   0x7   :  { %v58_v21 = vadd.f32 %v171_v2, %v38_v11  ;;  %vm70_vm0 = vcmp.ge.f32.partialorder %v54_v15, 0.0  ;;  %v86_v25 = vmul.f32 0.2, %v54_v15  ;;  %vm71_vm1 = vcmp.ge.f32.partialorder %v55_v16, 0.0 }
   0x8   :  { %v87_v26 = vmul.f32 0.2, %v55_v16  ;;  %vm72_vm2 = vcmp.ge.f32.partialorder %v56_v19, 0.0  ;;  %v88_v27 = vmul.f32 0.2, %v56_v19  ;;  %vm73_vm3 = vcmp.ge.f32.partialorder %v57_v20, 0.0 }
   0x9   :  { %v89_v28 = vmul.f32 0.2, %v57_v20  ;;  %v102_v29 = vsel %vm70_vm0, %v54_v15, %v86_v25  ;;  %vm74_vm4 = vcmp.ge.f32.partialorder %v58_v21, 0.0  ;;  %v90_v31 = vmul.f32 0.2, %v58_v21 }
   0xa   :  { %v103_v30 = vsel %vm71_vm1, %v55_v16, %v87_v26  ;;  %118 = vst [vmem:[%s301_s3] sm:$0xff] %v102_v29  ;;  %v104_v33 = vsel %vm72_vm2, %v56_v19, %v88_v27  ;;  %v42_v39 = vmul.f32 %v166_v1, %v22_v23  ;;  %v43_v40 = vmul.f32 %v166_v1, %v23_v24 }
   0xb   :  { %v105_v34 = vsel %vm73_vm3, %v57_v20, %v89_v28  ;;  %119 = vst [vmem:[%s301_s3 + $0x8] sm:$0xff] %v103_v30  ;;  %v106_v37 = vsel %vm74_vm4, %v58_v21, %v90_v31  ;;  %vm75_vm5 = vcmp.ge.f32.partialorder %v59_v35, 0.0  ;;  %v91_v42 = vmul.f32 0.2, %v59_v35 }
   0xc   :  { %120 = vst [vmem:[%s301_s3 + $0x10] sm:$0xff] %v104_v33  ;;  %vm76_vm6 = vcmp.ge.f32.partialorder %v60_v36, 0.0  ;;  %v44_v43 = vmul.f32 %v166_v1, %v24_v32  ;;  %v92_v44 = vmul.f32 0.2, %v60_v36  ;;  %vm77_vm7 = vcmp.ge.f32.partialorder %v61_v38, 0.0 }
   0xd   :  { %121 = vst [vmem:[%s301_s3 + $0x18] sm:$0xff] %v105_v34  ;;  %v93_v45 = vmul.f32 0.2, %v61_v38  ;;  %v62_v46 = vadd.f32 %v171_v2, %v42_v39  ;;  %v107_v47 = vsel %vm75_vm5, %v59_v35, %v91_v42  ;;  %v63_v48 = vadd.f32 %v171_v2, %v43_v40 }
   0xe   :  { %122 = vst [vmem:[%s301_s3 + $0x20] sm:$0xff] %v106_v37  ;;  %v64_v49 = vadd.f32 %v171_v2, %v44_v43  ;;  %v45_v50 = vmul.f32 %v166_v1, %v25_v41  ;;  %v108_v53 = vsel %vm76_vm6, %v60_v36, %v92_v44  ;;  %v46_v62 = vmul.f32 %v166_v1, %v26_v51 }
   0xf   :  { %123 = vst [vmem:[%s301_s3 + $0x28] sm:$0xff] %v107_v47  ;;  %v109_v54 = vsel %vm77_vm7, %v61_v38, %v93_v45  ;;  %vm78_vm8 = vcmp.ge.f32.partialorder %v62_v46, 0.0  ;;  %v94_v55 = vmul.f32 0.2, %v62_v46  ;;  %vm79_vm9 = vcmp.ge.f32.partialorder %v63_v48, 0.0 }
  0x10   :  { %124 = vst [vmem:[%s301_s3 + $0x30] sm:$0xff] %v108_v53  ;;  %v95_v57 = vmul.f32 0.2, %v63_v48  ;;  %vm80_vm10 = vcmp.ge.f32.partialorder %v64_v49, 0.0  ;;  %v65_v58 = vadd.f32 %v171_v2, %v45_v50  ;;  %v96_v61 = vmul.f32 0.2, %v64_v49 }
  0x11   :  { %125 = vst [vmem:[%s301_s3 + $0x38] sm:$0xff] %v109_v54  ;;  %v110_v60 = vsel %vm78_vm8, %v62_v46, %v94_v55  ;;  %v47_v63 = vmul.f32 %v166_v1, %v27_v52  ;;  %v48_v4 = vmul.f32 %v166_v1, %v28_v56  ;;  %v66_v6 = vadd.f32 %v171_v2, %v46_v62 }
  0x12   :  { %126 = vst [vmem:[%s301_s3 + $0x40] sm:$0xff] %v110_v60  ;;  %v111_v0 = vsel %vm79_vm9, %v63_v48, %v95_v57  ;;  %vm81_vm11 = vcmp.ge.f32.partialorder %v65_v58, 0.0  ;;  %v97_v3 = vmul.f32 0.2, %v65_v58  ;;  %v112_v5 = vsel %vm80_vm10, %v64_v49, %v96_v61 }
  0x13   :  { %127 = vst [vmem:[%s301_s3 + $0x48] sm:$0xff] %v111_v0  ;;  %v67_v7 = vadd.f32 %v171_v2, %v47_v63  ;;  %v49_v8 = vmul.f32 %v166_v1, %v29_v59  ;;  %v68_v10 = vadd.f32 %v171_v2, %v48_v4  ;;  %vm82_vm12 = vcmp.ge.f32.partialorder %v66_v6, 0.0 }
  0x14   :  { %128 = vst [vmem:[%s301_s3 + $0x50] sm:$0xff] %v112_v5  ;;  %v113_v9 = vsel %vm81_vm11, %v65_v58, %v97_v3  ;;  %v98_v11 = vmul.f32 0.2, %v66_v6 }
  0x15   :  { %129 = vst [vmem:[%s301_s3 + $0x58] sm:$0xff] %v113_v9  ;;  %vm83_vm13 = vcmp.ge.f32.partialorder %v67_v7, 0.0  ;;  %v69_v12 = vadd.f32 %v171_v2, %v49_v8  ;;  %v99_v13 = vmul.f32 0.2, %v67_v7  ;;  %vm84_vm14 = vcmp.ge.f32.partialorder %v68_v10, 0.0 }
  0x16   :  { %v100_v14 = vmul.f32 0.2, %v68_v10  ;;  %v114_v1 = vsel %vm82_vm12, %v66_v6, %v98_v11 }
  0x17   :  { %vm85_vm15 = vcmp.ge.f32.partialorder %v69_v12, 0.0  ;;  %v101_v15 = vmul.f32 0.2, %v69_v12  ;;  %130 = vst [vmem:[%s301_s3 + $0x60] sm:$0xff] %v114_v1  ;;  %v115_v16 = vsel %vm83_vm13, %v67_v7, %v99_v13 }
  0x18   :  { %v116_v17 = vsel %vm84_vm14, %v68_v10, %v100_v14  ;;  %131 = vst [vmem:[%s301_s3 + $0x68] sm:$0xff] %v115_v16 }
  0x19   :  { %v117_v18 = vsel %vm85_vm15, %v69_v12, %v101_v15  ;;  %132 = vst [vmem:[%s301_s3 + $0x70] sm:$0xff] %v116_v17 }
  0x1a   :  { %133 = vst [vmem:[%s301_s3 + $0x78] sm:$0xff] %v117_v18 }

// kernel: nlayer_discriminator_forward.16
= control target key start
LH: loop header
LB: loop body
LE: loop exit
PB: predicated region body
PF: predicated region fallthrough
CT: control target
= control target key end

     0   :  { %v57_v0 = vmov 0.0   ;;  %s103_s1 = inlined_call_operand.vmem [shape: f32[1,128], index: 1, kind: output, shape index: {0}]   ;;  %s104_s2 = inlined_call_operand.vmem [shape: f32[1,128], index: 2, kind: output, shape index: {1}]   ;;  %s105_s0 = inlined_call_operand.vmem [shape: f32[32,128], index: 0, kind: input, shape index: {}]  }
   0x1   :  { %14 = vst [vmem:[%s103_s1] sm:$0x1] %v57_v0  ;;  %v16_v1 = vld [vmem:[%s105_s0] sm:$0xff]  ;;  %v17_v2 = vld [vmem:[%s105_s0 + $0x8] sm:$0xff]  ;;  %v18_v3 = vld [vmem:[%s105_s0 + $0x10] sm:$0xff] }
   0x2   :  { %15 = vst [vmem:[%s104_s2] sm:$0x1] %v57_v0  ;;  %v19_v4 = vld [vmem:[%s105_s0 + $0x18] sm:$0xff]  ;;  %v21_v5 = vadd.f32 %v17_v2, %v16_v1  ;;  %v33_v6 = vmul.f32 %v16_v1, %v16_v1  ;;  %v34_v7 = vmul.f32 %v17_v2, %v17_v2  ;;  %v35_v8 = vmul.f32 %v18_v3, %v18_v3 }
   0x3   :  { %v36_v10 = vmul.f32 %v19_v4, %v19_v4 }
   0x4   :  { %v22_v9 = vadd.f32 %v21_v5, %v18_v3  ;;  %v37_v11 = vadd.f32 %v34_v7, %v33_v6 }
   0x6   :  { %v23_v12 = vadd.f32 %v22_v9, %v19_v4  ;;  %v38_v13 = vadd.f32 %v37_v11, %v35_v8 }
   0x8   :  { %v24_v14 = vrot.slane %v23_v12, 4  ;;  %v39_v15 = vadd.f32 %v38_v13, %v36_v10  ;;  %v20_v24 = vld [vmem:[%s103_s1] sm:$0x1] }
   0x9   :  { %v32_v27 = vld [vmem:[%s104_s2] sm:$0x1] }
   0xa   :  { %v25_v16 = vadd.f32 %v24_v14, %v23_v12  ;;  %v40_v17 = vrot.slane %v39_v15, 4 }
   0xc   :  { %v26_v18 = vrot.slane %v25_v16, 2  ;;  %v41_v19 = vadd.f32 %v40_v17, %v39_v15 }
   0xe   :  { %v27_v20 = vadd.f32 %v26_v18, %v25_v16  ;;  %v42_v21 = vrot.slane %v41_v19, 2 }
  0x10   :  { %v28_v22 = vrot.slane %v27_v20, 1  ;;  %v43_v23 = vadd.f32 %v42_v21, %v41_v19 }
  0x12   :  { %v29_v25 = vadd.f32 %v28_v22, %v27_v20  ;;  %v44_v26 = vrot.slane %v43_v23, 1 }
  0x14   :  { %v30_v28 = vadd.f32 %v29_v25, %v20_v24  ;;  %v45_v29 = vadd.f32 %v44_v26, %v43_v23 }
  0x16   :  { %31 = vst [vmem:[%s103_s1] sm:$0x1] %v30_v28  ;;  %v46_v30 = vadd.f32 %v45_v29, %v32_v27 }
  0x18   :  { %47 = vst [vmem:[%s104_s2] sm:$0x1] %v46_v30 }

// kernel: nlayer_discriminator_forward.17
= control target key start
LH: loop header
LB: loop body
LE: loop exit
PB: predicated region body
PF: predicated region fallthrough
CT: control target
= control target key end

     0   :  { %s106_s0 = inlined_call_operand.vmem [shape: f32[32,128], index: 0, kind: input, shape index: {}]   ;;  %s107_s1 = inlined_call_operand.vmem [shape: f32[1,128], index: 1, kind: input, shape index: {}]   ;;  %s108_s2 = inlined_call_operand.vmem [shape: f32[1,128], index: 2, kind: input, shape index: {}]   ;;  %s109_s3 = inlined_call_operand.vmem [shape: f32[32,128], index: 3, kind: output, shape index: {}]  }
   0x1   :  { %v14_v0 = vld [vmem:[%s106_s0] sm:$0xff]  ;;  %v15_v3 = vld [vmem:[%s106_s0 + $0x8] sm:$0xff]  ;;  %v16_v6 = vld [vmem:[%s106_s0 + $0x10] sm:$0xff] }
   0x2   :  { %v54_v1 = vld [vmem:[%s107_s1] ss:$0 sm:$0xff]  ;;  %v17_v7 = vld [vmem:[%s106_s0 + $0x18] sm:$0xff] }
   0x3   :  { %v55_v2 = vld [vmem:[%s108_s2] ss:$0 sm:$0xff]  ;;  %v22_v4 = vmul.f32 %v54_v1, %v14_v0  ;;  %v23_v5 = vmul.f32 %v54_v1, %v15_v3  ;;  %v24_v8 = vmul.f32 %v54_v1, %v16_v6  ;;  %v25_v9 = vmul.f32 %v54_v1, %v17_v7 }
   0x5   :  { %v30_v10 = vadd.f32 %v55_v2, %v22_v4  ;;  %v31_v11 = vadd.f32 %v55_v2, %v23_v5  ;;  %v32_v12 = vadd.f32 %v55_v2, %v24_v8  ;;  %v33_v13 = vadd.f32 %v55_v2, %v25_v9 }
   0x7   :  { %vm34_vm0 = vcmp.ge.f32.partialorder %v30_v10, 0.0  ;;  %v38_v14 = vmul.f32 0.2, %v30_v10  ;;  %vm35_vm1 = vcmp.ge.f32.partialorder %v31_v11, 0.0  ;;  %v39_v15 = vmul.f32 0.2, %v31_v11 }
   0x8   :  { %vm36_vm2 = vcmp.ge.f32.partialorder %v32_v12, 0.0  ;;  %v40_v16 = vmul.f32 0.2, %v32_v12  ;;  %vm37_vm3 = vcmp.ge.f32.partialorder %v33_v13, 0.0  ;;  %v41_v17 = vmul.f32 0.2, %v33_v13 }
   0x9   :  { %v42_v18 = vsel %vm34_vm0, %v30_v10, %v38_v14  ;;  %v43_v19 = vsel %vm35_vm1, %v31_v11, %v39_v15 }
   0xa   :  { %46 = vst [vmem:[%s109_s3] sm:$0xff] %v42_v18  ;;  %v44_v20 = vsel %vm36_vm2, %v32_v12, %v40_v16  ;;  %v45_v21 = vsel %vm37_vm3, %v33_v13, %v41_v17 }
   0xb   :  { %47 = vst [vmem:[%s109_s3 + $0x8] sm:$0xff] %v43_v19 }
   0xc   :  { %48 = vst [vmem:[%s109_s3 + $0x10] sm:$0xff] %v44_v20 }
   0xd   :  { %49 = vst [vmem:[%s109_s3 + $0x18] sm:$0xff] %v45_v21 }

// kernel: nlayer_discriminator_forward.15
= control target key start
LH: loop header
LB: loop body
LE: loop exit
PB: predicated region body
PF: predicated region fallthrough
CT: control target
= control target key end

     0   :  { %s471_s1 = inlined_call_operand.vmem [shape: bf16[256,128], index: 1, kind: input, shape index: {}]   ;;  %s472_s0 = inlined_call_operand.vmem [shape: bf16[32,256], index: 0, kind: input, shape index: {}]   ;;  %s473_s2 = inlined_call_operand.vmem [shape: f32[1,128], index: 2, kind: input, shape index: {}]   ;;  %s474_s3 = inlined_call_operand.vmem [shape: f32[32,128], index: 3, kind: output, shape index: {}]  }
   0x1   :  { %v338_v0 = vld [vmem:[%s471_s1 + $0x38] sm:$0xff]  ;;  %v337_v2 = vld [vmem:[%s471_s1 + $0x30] sm:$0xff]  ;;  %v336_v4 = vld [vmem:[%s471_s1 + $0x28] sm:$0xff] }
   0x2   :  { %v346_v1 = vld [vmem:[%s471_s1 + $0x78] sm:$0xff]  ;;  %178 = vmatpush.bf16.msra.mxu0 %v338_v0  ;;  %347 = vmatpush.bf16.msra.mxu2 %v338_v0  ;;  %v345_v3 = vld [vmem:[%s471_s1 + $0x70] sm:$0xff]  ;;  %v344_v5 = vld [vmem:[%s471_s1 + $0x68] sm:$0xff] }
   0x3   :  { %197 = vmatpush.bf16.msra.mxu1 %v346_v1  ;;  %355 = vmatpush.bf16.msra.mxu3 %v346_v1  ;;  %v335_v6 = vld [vmem:[%s471_s1 + $0x20] sm:$0xff]  ;;  %v334_v8 = vld [vmem:[%s471_s1 + $0x18] sm:$0xff]  ;;  %v333_v10 = vld [vmem:[%s471_s1 + $0x10] sm:$0xff] }
   0x4   :  { %v343_v7 = vld [vmem:[%s471_s1 + $0x60] sm:$0xff]  ;;  %v342_v9 = vld [vmem:[%s471_s1 + $0x58] sm:$0xff]  ;;  %v341_v11 = vld [vmem:[%s471_s1 + $0x50] sm:$0xff] }
   0x5   :  { %v332_v12 = vld [vmem:[%s471_s1 + $0x8] sm:$0xff]  ;;  %v331_v14 = vld [vmem:[%s471_s1] sm:$0xff]  ;;  %v257_v18 = vld [vmem:[%s472_s0 + $0x10] sm:$0xf] }
   0x6   :  { %179 = vmatpush.bf16.msra.mxu0 %v337_v2  ;;  %348 = vmatpush.bf16.msra.mxu2 %v337_v2  ;;  %v340_v13 = vld [vmem:[%s471_s1 + $0x48] sm:$0xff]  ;;  %v339_v15 = vld [vmem:[%s471_s1 + $0x40] sm:$0xff]  ;;  %v330_v19 = vld [vmem:[%s472_s0 + $0x14] sm:$0xf0] }
   0x7   :  { %198 = vmatpush.bf16.msra.mxu1 %v345_v3  ;;  %356 = vmatpush.bf16.msra.mxu3 %v345_v3  ;;  %v249_v16 = vld [vmem:[%s472_s0] sm:$0xf]  ;;  %v328_v17 = vld [vmem:[%s472_s0 + $0x4] sm:$0xf0]  ;;  %v327_v20 = vld [vmem:[%s472_s0 + $0x4] sm:$0xf]  ;;  %v258_v25 = vor.u32 %v330_v19, %v257_v18 }
   0x8   :  { %v251_v21 = vld [vmem:[%s472_s0 + $0x8] sm:$0xf0]  ;;  %v329_v22 = vld [vmem:[%s472_s0 + $0x14] sm:$0xf]  ;;  %v259_v23 = vld [vmem:[%s472_s0 + $0x18] sm:$0xf0]  ;;  %v250_v24 = vor.u32 %v328_v17, %v249_v16 }
   0x9   :  { %v254_v26 = vor.u32 %v327_v20, %v251_v21  ;;  %v262_v27 = vor.u32 %v329_v22, %v259_v23  ;;  %v363_v29 = vld [vmem:[%s473_s2] ss:$0 sm:$0xff] }
   0xa   :  { %180 = vmatpush.bf16.msra.mxu0 %v336_v4  ;;  %349 = vmatpush.bf16.msra.mxu2 %v336_v4 }
   0xb   :  { %199 = vmatpush.bf16.msra.mxu1 %v344_v5  ;;  %357 = vmatpush.bf16.msra.mxu3 %v344_v5 }
   0xe   :  { %181 = vmatpush.bf16.msra.mxu0 %v335_v6  ;;  %350 = vmatpush.bf16.msra.mxu2 %v335_v6 }
   0xf   :  { %200 = vmatpush.bf16.msra.mxu1 %v343_v7  ;;  %358 = vmatpush.bf16.msra.mxu3 %v343_v7 }
  0x12   :  { %182 = vmatpush.bf16.msra.mxu0 %v334_v8  ;;  %351 = vmatpush.bf16.msra.mxu2 %v334_v8 }
  0x13   :  { %201 = vmatpush.bf16.msra.mxu1 %v342_v9  ;;  %359 = vmatpush.bf16.msra.mxu3 %v342_v9 }
  0x16   :  { %183 = vmatpush.bf16.msra.mxu0 %v333_v10  ;;  %352 = vmatpush.bf16.msra.mxu2 %v333_v10 }
  0x17   :  { %202 = vmatpush.bf16.msra.mxu1 %v341_v11  ;;  %360 = vmatpush.bf16.msra.mxu3 %v341_v11 }
  0x1a   :  { %184 = vmatpush.bf16.msra.mxu0 %v332_v12  ;;  %353 = vmatpush.bf16.msra.mxu2 %v332_v12 }
  0x1b   :  { %203 = vmatpush.bf16.msra.mxu1 %v340_v13  ;;  %361 = vmatpush.bf16.msra.mxu3 %v340_v13 }
  0x1e   :  { %185 = vmatpush.bf16.msra.mxu0 %v331_v14  ;;  %354 = vmatpush.bf16.msra.mxu2 %v331_v14 }
  0x1f   :  { %204 = vmatpush.bf16.msra.mxu1 %v339_v15  ;;  %362 = vmatpush.bf16.msra.mxu3 %v339_v15 }
  0x21   :  { %186 = vmatmul.bf16.vlgmr.msra.gmra.mxu0 %v250_v24  ;;  %191 = vmatmul.bf16.vlgmr.msra.gmra.mxu2 %v258_v25 }
  0x22   :  { %205 = vmatmul.bf16.vlgmr.msra.gmra.mxu1 %v254_v26  ;;  %210 = vmatmul.bf16.vlgmr.msra.gmra.mxu3 %v262_v27 }
  0x9e   :  { %v187_v28 = vpop.f32.mrf.mxu0 }
  0x9f   :  { %v206_v30 = vpop.f32.mrf.mxu1 }
  0xa0   :  { %v207_v31 = vadd.f32 %v206_v30, %v187_v28 }
  0xa2   :  { %v235_v32 = vadd.f32 %v363_v29, %v207_v31 }
  0xa4   :  { %239 = vst [vmem:[%s474_s3] sm:$0xff] %v235_v32  ;;  %v192_v33 = vpop.f32.mrf.mxu2 }
  0xa5   :  { %v211_v34 = vpop.f32.mrf.mxu3 }
  0xa6   :  { %v212_v35 = vadd.f32 %v211_v34, %v192_v33  ;;  %v189_v36 = vpop.f32.mrf.mxu0 }
  0xa7   :  { %v208_v37 = vpop.f32.mrf.mxu1 }
  0xa8   :  { %v237_v38 = vadd.f32 %v363_v29, %v212_v35  ;;  %v209_v39 = vadd.f32 %v208_v37, %v189_v36 }
  0xaa   :  { %241 = vst [vmem:[%s474_s3 + $0x10] sm:$0xff] %v237_v38  ;;  %v236_v40 = vadd.f32 %v363_v29, %v209_v39 }
  0xac   :  { %240 = vst [vmem:[%s474_s3 + $0x8] sm:$0xff] %v236_v40  ;;  %v194_v41 = vpop.f32.mrf.mxu2 }
  0xad   :  { %v213_v42 = vpop.f32.mrf.mxu3 }
  0xae   :  { %v214_v43 = vadd.f32 %v213_v42, %v194_v41 }
  0xb0   :  { %v238_v44 = vadd.f32 %v363_v29, %v214_v43 }
  0xb2   :  { %242 = vst [vmem:[%s474_s3 + $0x18] sm:$0xff] %v238_v44 }

// kernel: nlayer_discriminator_forward.19
= control target key start
LH: loop header
LB: loop body
LE: loop exit
PB: predicated region body
PF: predicated region fallthrough
CT: control target
= control target key end

     0   :  { %v53_v0 = vmov 0.0   ;;  %s96_s1 = inlined_call_operand.vmem [shape: f32[1,128], index: 1, kind: output, shape index: {0}]   ;;  %s97_s2 = inlined_call_operand.vmem [shape: f32[1,128], index: 2, kind: output, shape index: {1}]   ;;  %s98_s0 = inlined_call_operand.vmem [shape: f32[24,128], index: 0, kind: input, shape index: {}]  }
   0x1   :  { %14 = vst [vmem:[%s96_s1] sm:$0x1] %v53_v0  ;;  %v16_v1 = vld [vmem:[%s98_s0] sm:$0xff]  ;;  %v17_v2 = vld [vmem:[%s98_s0 + $0x8] sm:$0xff]  ;;  %v18_v3 = vld [vmem:[%s98_s0 + $0x10] sm:$0xff] }
   0x2   :  { %15 = vst [vmem:[%s97_s2] sm:$0x1] %v53_v0  ;;  %v20_v4 = vadd.f32 %v17_v2, %v16_v1  ;;  %v31_v5 = vmul.f32 %v16_v1, %v16_v1  ;;  %v32_v6 = vmul.f32 %v17_v2, %v17_v2  ;;  %v33_v7 = vmul.f32 %v18_v3, %v18_v3 }
   0x4   :  { %v21_v8 = vadd.f32 %v20_v4, %v18_v3  ;;  %v34_v9 = vadd.f32 %v32_v6, %v31_v5 }
   0x6   :  { %v22_v10 = vrot.slane %v21_v8, 4  ;;  %v35_v11 = vadd.f32 %v34_v9, %v33_v7 }
   0x8   :  { %v23_v12 = vadd.f32 %v22_v10, %v21_v8  ;;  %v36_v13 = vrot.slane %v35_v11, 4  ;;  %v19_v20 = vld [vmem:[%s96_s1] sm:$0x1] }
   0x9   :  { %v30_v23 = vld [vmem:[%s97_s2] sm:$0x1] }
   0xa   :  { %v24_v14 = vrot.slane %v23_v12, 2  ;;  %v37_v15 = vadd.f32 %v36_v13, %v35_v11 }
   0xc   :  { %v25_v16 = vadd.f32 %v24_v14, %v23_v12  ;;  %v38_v17 = vrot.slane %v37_v15, 2 }
   0xe   :  { %v26_v18 = vrot.slane %v25_v16, 1  ;;  %v39_v19 = vadd.f32 %v38_v17, %v37_v15 }
  0x10   :  { %v27_v21 = vadd.f32 %v26_v18, %v25_v16  ;;  %v40_v22 = vrot.slane %v39_v19, 1 }
  0x12   :  { %v28_v24 = vadd.f32 %v27_v21, %v19_v20  ;;  %v41_v25 = vadd.f32 %v40_v22, %v39_v19 }
  0x14   :  { %29 = vst [vmem:[%s96_s1] sm:$0x1] %v28_v24  ;;  %v42_v26 = vadd.f32 %v41_v25, %v30_v23 }
  0x16   :  { %43 = vst [vmem:[%s97_s2] sm:$0x1] %v42_v26 }

// kernel: nlayer_discriminator_forward.20
= control target key start
LH: loop header
LB: loop body
LE: loop exit
PB: predicated region body
PF: predicated region fallthrough
CT: control target
= control target key end

     0   :  { %s93_s0 = inlined_call_operand.vmem [shape: f32[24,128], index: 0, kind: input, shape index: {}]   ;;  %s94_s1 = inlined_call_operand.vmem [shape: f32[1,128], index: 1, kind: input, shape index: {}]   ;;  %s95_s2 = inlined_call_operand.vmem [shape: f32[1,128], index: 2, kind: input, shape index: {}]   ;;  %s96_s3 = inlined_call_operand.vmem [shape: f32[24,128], index: 3, kind: output, shape index: {}]  }
   0x1   :  { %v14_v0 = vld [vmem:[%s93_s0] sm:$0xff]  ;;  %v15_v3 = vld [vmem:[%s93_s0 + $0x8] sm:$0xff]  ;;  %v16_v6 = vld [vmem:[%s93_s0 + $0x10] sm:$0xff] }
   0x2   :  { %v47_v1 = vld [vmem:[%s94_s1] ss:$0 sm:$0xff] }
   0x3   :  { %v48_v2 = vld [vmem:[%s95_s2] ss:$0 sm:$0xff]  ;;  %v21_v4 = vmul.f32 %v47_v1, %v14_v0  ;;  %v22_v5 = vmul.f32 %v47_v1, %v15_v3  ;;  %v23_v7 = vmul.f32 %v47_v1, %v16_v6 }
   0x5   :  { %v28_v8 = vadd.f32 %v48_v2, %v21_v4  ;;  %v29_v9 = vadd.f32 %v48_v2, %v22_v5  ;;  %v30_v10 = vadd.f32 %v48_v2, %v23_v7 }
   0x7   :  { %vm31_vm0 = vcmp.ge.f32.partialorder %v28_v8, 0.0  ;;  %v34_v11 = vmul.f32 0.2, %v28_v8  ;;  %vm32_vm1 = vcmp.ge.f32.partialorder %v29_v9, 0.0  ;;  %v35_v12 = vmul.f32 0.2, %v29_v9 }
   0x8   :  { %vm33_vm2 = vcmp.ge.f32.partialorder %v30_v10, 0.0  ;;  %v36_v13 = vmul.f32 0.2, %v30_v10 }
   0x9   :  { %v37_v14 = vsel %vm31_vm0, %v28_v8, %v34_v11  ;;  %v38_v15 = vsel %vm32_vm1, %v29_v9, %v35_v12 }
   0xa   :  { %40 = vst [vmem:[%s96_s3] sm:$0xff] %v37_v14  ;;  %v39_v16 = vsel %vm33_vm2, %v30_v10, %v36_v13 }
   0xb   :  { %41 = vst [vmem:[%s96_s3 + $0x8] sm:$0xff] %v38_v15 }
   0xc   :  { %42 = vst [vmem:[%s96_s3 + $0x10] sm:$0xff] %v39_v16 }

// kernel: nlayer_discriminator_forward.18
= control target key start
LH: loop header
LB: loop body
LE: loop exit
PB: predicated region body
PF: predicated region fallthrough
CT: control target
= control target key end

     0   :  { %s817_s1 = inlined_call_operand.vmem [shape: bf16[512,128], index: 1, kind: input, shape index: {}]   ;;  %s818_s0 = inlined_call_operand.vmem [shape: bf16[32,512], index: 0, kind: input, shape index: {}]   ;;  %s819_s2 = inlined_call_operand.vmem [shape: f32[1,128], index: 2, kind: input, shape index: {}]   ;;  %s820_s3 = inlined_call_operand.vmem [shape: f32[32,128], index: 3, kind: output, shape index: {}]  }
   0x1   :  { %v612_v0 = vld [vmem:[%s817_s1 + $0x38] sm:$0xff]  ;;  %v611_v4 = vld [vmem:[%s817_s1 + $0x30] sm:$0xff]  ;;  %v610_v8 = vld [vmem:[%s817_s1 + $0x28] sm:$0xff] }
   0x2   :  { %v620_v1 = vld [vmem:[%s817_s1 + $0x78] sm:$0xff]  ;;  %330 = vmatpush.bf16.msra.mxu0 %v612_v0  ;;  %v619_v5 = vld [vmem:[%s817_s1 + $0x70] sm:$0xff]  ;;  %v618_v9 = vld [vmem:[%s817_s1 + $0x68] sm:$0xff] }
   0x3   :  { %v628_v2 = vld [vmem:[%s817_s1 + $0xb8] sm:$0xff]  ;;  %349 = vmatpush.bf16.msra.mxu1 %v620_v1  ;;  %v627_v6 = vld [vmem:[%s817_s1 + $0xb0] sm:$0xff]  ;;  %v626_v10 = vld [vmem:[%s817_s1 + $0xa8] sm:$0xff] }
   0x4   :  { %v636_v3 = vld [vmem:[%s817_s1 + $0xf8] sm:$0xff]  ;;  %368 = vmatpush.bf16.msra.mxu2 %v628_v2  ;;  %v635_v7 = vld [vmem:[%s817_s1 + $0xf0] sm:$0xff]  ;;  %v634_v11 = vld [vmem:[%s817_s1 + $0xe8] sm:$0xff] }
   0x5   :  { %387 = vmatpush.bf16.msra.mxu3 %v636_v3  ;;  %v609_v12 = vld [vmem:[%s817_s1 + $0x20] sm:$0xff]  ;;  %v608_v16 = vld [vmem:[%s817_s1 + $0x18] sm:$0xff]  ;;  %v607_v20 = vld [vmem:[%s817_s1 + $0x10] sm:$0xff] }
   0x6   :  { %331 = vmatpush.bf16.msra.mxu0 %v611_v4  ;;  %v617_v13 = vld [vmem:[%s817_s1 + $0x60] sm:$0xff]  ;;  %v616_v17 = vld [vmem:[%s817_s1 + $0x58] sm:$0xff]  ;;  %v615_v21 = vld [vmem:[%s817_s1 + $0x50] sm:$0xff] }
   0x7   :  { %350 = vmatpush.bf16.msra.mxu1 %v619_v5  ;;  %v625_v14 = vld [vmem:[%s817_s1 + $0xa0] sm:$0xff]  ;;  %v624_v18 = vld [vmem:[%s817_s1 + $0x98] sm:$0xff]  ;;  %v623_v22 = vld [vmem:[%s817_s1 + $0x90] sm:$0xff] }
   0x8   :  { %369 = vmatpush.bf16.msra.mxu2 %v627_v6  ;;  %v633_v15 = vld [vmem:[%s817_s1 + $0xe0] sm:$0xff]  ;;  %v632_v19 = vld [vmem:[%s817_s1 + $0xd8] sm:$0xff]  ;;  %v631_v23 = vld [vmem:[%s817_s1 + $0xd0] sm:$0xff] }
   0x9   :  { %388 = vmatpush.bf16.msra.mxu3 %v635_v7  ;;  %v606_v24 = vld [vmem:[%s817_s1 + $0x8] sm:$0xff]  ;;  %v605_v28 = vld [vmem:[%s817_s1] sm:$0xff]  ;;  %v599_v33 = vld [vmem:[%s818_s0 + $0xc] sm:$0xf0] }
   0xa   :  { %332 = vmatpush.bf16.msra.mxu0 %v610_v8  ;;  %v614_v25 = vld [vmem:[%s817_s1 + $0x48] sm:$0xff]  ;;  %v613_v29 = vld [vmem:[%s817_s1 + $0x40] sm:$0xff]  ;;  %v441_v35 = vld [vmem:[%s818_s0 + $0x10] sm:$0xf0] }
   0xb   :  { %351 = vmatpush.bf16.msra.mxu1 %v618_v9  ;;  %v622_v26 = vld [vmem:[%s817_s1 + $0x88] sm:$0xff]  ;;  %v621_v30 = vld [vmem:[%s817_s1 + $0x80] sm:$0xff]  ;;  %v600_v37 = vld [vmem:[%s818_s0 + $0x14] sm:$0xf0] }
   0xc   :  { %370 = vmatpush.bf16.msra.mxu2 %v626_v10  ;;  %v630_v27 = vld [vmem:[%s817_s1 + $0xc8] sm:$0xff]  ;;  %v629_v31 = vld [vmem:[%s817_s1 + $0xc0] sm:$0xff]  ;;  %v449_v39 = vld [vmem:[%s818_s0 + $0x18] sm:$0xf0] }
   0xd   :  { %389 = vmatpush.bf16.msra.mxu3 %v634_v11  ;;  %v439_v32 = vld [vmem:[%s818_s0] sm:$0xf]  ;;  %v597_v34 = vld [vmem:[%s818_s0 + $0x4] sm:$0xf]  ;;  %v447_v36 = vld [vmem:[%s818_s0 + $0x8] sm:$0xf] }
   0xe   :  { %333 = vmatpush.bf16.msra.mxu0 %v609_v12  ;;  %v598_v38 = vld [vmem:[%s818_s0 + $0xc] sm:$0xf]  ;;  %v440_v40 = vor.u32 %v599_v33, %v439_v32  ;;  %v444_v41 = vor.u32 %v597_v34, %v441_v35  ;;  %v448_v42 = vor.u32 %v600_v37, %v447_v36  ;;  %v455_v44 = vld [vmem:[%s818_s0 + $0x20] sm:$0xf]  ;;  %v603_v45 = vld [vmem:[%s818_s0 + $0x2c] sm:$0xf0] }
   0xf   :  { %352 = vmatpush.bf16.msra.mxu1 %v617_v13  ;;  %v452_v43 = vor.u32 %v598_v38, %v449_v39  ;;  %v601_v46 = vld [vmem:[%s818_s0 + $0x24] sm:$0xf]  ;;  %v457_v47 = vld [vmem:[%s818_s0 + $0x30] sm:$0xf0]  ;;  %v463_v48 = vld [vmem:[%s818_s0 + $0x28] sm:$0xf]  ;;  %v456_v52 = vor.u32 %v603_v45, %v455_v44 }
  0x10   :  { %371 = vmatpush.bf16.msra.mxu2 %v625_v14  ;;  %v604_v49 = vld [vmem:[%s818_s0 + $0x34] sm:$0xf0]  ;;  %v602_v50 = vld [vmem:[%s818_s0 + $0x2c] sm:$0xf]  ;;  %v465_v51 = vld [vmem:[%s818_s0 + $0x38] sm:$0xf0]  ;;  %v460_v53 = vor.u32 %v601_v46, %v457_v47 }
  0x11   :  { %390 = vmatpush.bf16.msra.mxu3 %v633_v15  ;;  %v464_v54 = vor.u32 %v604_v49, %v463_v48  ;;  %v468_v55 = vor.u32 %v602_v50, %v465_v51  ;;  %v637_v62 = vld [vmem:[%s819_s2] ss:$0 sm:$0xff] }
  0x12   :  { %334 = vmatpush.bf16.msra.mxu0 %v608_v16 }
  0x13   :  { %353 = vmatpush.bf16.msra.mxu1 %v616_v17 }
  0x14   :  { %372 = vmatpush.bf16.msra.mxu2 %v624_v18 }
  0x15   :  { %391 = vmatpush.bf16.msra.mxu3 %v632_v19 }
  0x16   :  { %335 = vmatpush.bf16.msra.mxu0 %v607_v20 }
  0x17   :  { %354 = vmatpush.bf16.msra.mxu1 %v615_v21 }
  0x18   :  { %373 = vmatpush.bf16.msra.mxu2 %v623_v22 }
  0x19   :  { %392 = vmatpush.bf16.msra.mxu3 %v631_v23 }
  0x1a   :  { %336 = vmatpush.bf16.msra.mxu0 %v606_v24 }
  0x1b   :  { %355 = vmatpush.bf16.msra.mxu1 %v614_v25 }
  0x1c   :  { %374 = vmatpush.bf16.msra.mxu2 %v622_v26 }
  0x1d   :  { %393 = vmatpush.bf16.msra.mxu3 %v630_v27 }
  0x1e   :  { %337 = vmatpush.bf16.msra.mxu0 %v605_v28 }
  0x1f   :  { %356 = vmatpush.bf16.msra.mxu1 %v613_v29 }
  0x20   :  { %375 = vmatpush.bf16.msra.mxu2 %v621_v30 }
  0x21   :  { %394 = vmatpush.bf16.msra.mxu3 %v629_v31  ;;  %338 = vmatmul.bf16.vlgmr.msra.gmra.mxu0 %v440_v40 }
  0x22   :  { %357 = vmatmul.bf16.vlgmr.msra.gmra.mxu1 %v444_v41 }
  0x23   :  { %376 = vmatmul.bf16.vlgmr.msra.gmra.mxu2 %v448_v42 }
  0x24   :  { %395 = vmatmul.bf16.vlgmr.msra.gmra.mxu3 %v452_v43 }
  0x31   :  { %343 = vmatmul.bf16.gmra.mxu0 %v456_v52 }
  0x32   :  { %362 = vmatmul.bf16.gmra.mxu1 %v460_v53 }
  0x33   :  { %381 = vmatmul.bf16.gmra.mxu2 %v464_v54 }
  0x34   :  { %400 = vmatmul.bf16.gmra.mxu3 %v468_v55 }
  0x9e   :  { %v339_v56 = vpop.f32.mrf.mxu0 }
  0x9f   :  { %v358_v57 = vpop.f32.mrf.mxu1 }
  0xa0   :  { %v359_v58 = vadd.f32 %v358_v57, %v339_v56 }
  0xa6   :  { %v377_v59 = vpop.f32.mrf.mxu2  ;;  %v341_v63 = vpop.f32.mrf.mxu0 }
  0xa7   :  { %v396_v60 = vpop.f32.mrf.mxu3  ;;  %v378_v61 = vadd.f32 %v377_v59, %v359_v58  ;;  %v360_v0 = vpop.f32.mrf.mxu1 }
  0xa8   :  { %v361_v3 = vadd.f32 %v360_v0, %v341_v63 }
  0xa9   :  { %v397_v1 = vadd.f32 %v396_v60, %v378_v61 }
  0xab   :  { %v425_v2 = vadd.f32 %v637_v62, %v397_v1 }
  0xad   :  { %429 = vst [vmem:[%s820_s3] sm:$0xff] %v425_v2 }
  0xae   :  { %v379_v4 = vpop.f32.mrf.mxu2  ;;  %v344_v7 = vpop.f32.mrf.mxu0 }
  0xaf   :  { %v398_v5 = vpop.f32.mrf.mxu3  ;;  %v380_v6 = vadd.f32 %v379_v4, %v361_v3  ;;  %v363_v8 = vpop.f32.mrf.mxu1 }
  0xb0   :  { %v364_v11 = vadd.f32 %v363_v8, %v344_v7 }
  0xb1   :  { %v399_v9 = vadd.f32 %v398_v5, %v380_v6 }
  0xb3   :  { %v426_v10 = vadd.f32 %v637_v62, %v399_v9 }
  0xb5   :  { %430 = vst [vmem:[%s820_s3 + $0x8] sm:$0xff] %v426_v10 }
  0xb6   :  { %v382_v12 = vpop.f32.mrf.mxu2  ;;  %v346_v16 = vpop.f32.mrf.mxu0 }
  0xb7   :  { %v401_v13 = vpop.f32.mrf.mxu3  ;;  %v383_v14 = vadd.f32 %v382_v12, %v364_v11  ;;  %v365_v17 = vpop.f32.mrf.mxu1 }
  0xb8   :  { %v366_v19 = vadd.f32 %v365_v17, %v346_v16 }
  0xb9   :  { %v402_v15 = vadd.f32 %v401_v13, %v383_v14 }
  0xbb   :  { %v427_v18 = vadd.f32 %v637_v62, %v402_v15 }
  0xbd   :  { %431 = vst [vmem:[%s820_s3 + $0x10] sm:$0xff] %v427_v18 }
  0xbe   :  { %v384_v20 = vpop.f32.mrf.mxu2 }
  0xbf   :  { %v385_v21 = vadd.f32 %v384_v20, %v366_v19  ;;  %v403_v22 = vpop.f32.mrf.mxu3 }
  0xc1   :  { %v404_v23 = vadd.f32 %v403_v22, %v385_v21 }
  0xc3   :  { %v428_v24 = vadd.f32 %v637_v62, %v404_v23 }
  0xc5   :  { %432 = vst [vmem:[%s820_s3 + $0x18] sm:$0xff] %v428_v24 }

// kernel: nlayer_discriminator_forward.21
= control target key start
LH: loop header
LB: loop body
LE: loop exit
PB: predicated region body
PF: predicated region fallthrough
CT: control target
= control target key end

     0   :  { %s1053_s12 = smov 0   ;;  %s1055_s13 = smov 0   ;;  %s1173_s0 = inlined_call_operand.vmem [shape: bf16[16,1024], index: 0, kind: input, shape index: {}]   ;;  %s1174_s1 = inlined_call_operand.vmem [shape: bf16[1024,128], index: 1, kind: input, shape index: {}]   ;;  %s1175_s2 = inlined_call_operand.vmem [shape: f32[1,128], index: 2, kind: input, shape index: {}]   ;;  %s1176_s3 = inlined_call_operand.vmem [shape: f32[16,128], index: 3, kind: output, shape index: {}]  }
   0x1   :  { %s1057_s14 = smov 0   ;;  %s1059_s15 = smov 0  }
   0x2   :  { %s1061_s16 = smov 0  }
   0x3 LB: > { %s25_s17 = sadd.s32 1, %s1026_s15  ;;  %p48_p1 = scmp.ne.s32.totalorder %s1018_s13, %s1014_s12  ;;  %s1030_s16 = sphi %s1061_s16, %s13_s16   ;;  %s1026_s15 = sphi %s1059_s15, %s1180_s15   ;;  %s1022_s14 = sphi %s1057_s14, %s1179_s14   ;;  %s1018_s13 = sphi %s1055_s13, %s1178_s13   ;;  %s1014_s12 = sphi %s1053_s12, %s1177_s12  }
   0x4   : > { %p26_p0 = scmp.ge.s32.totalorder %s25_s17, 2  ;;  %p49_p2 = scmp.eq.s32.totalorder %s1030_s16, 0 }
   0x5   : > { %s41_s19 = sadd.s32 1, %s1018_s13  ;;  %p755_p5 = scmp.ge.s32.totalorder %s1030_s16, 2 }
   0x6   : > { %s1182_s17 = smov (%p26_p0, %s25_s17), 0  ;;  %p50_p3 = por %p49_p2, %p48_p1 }
   0x7   : > { %s37_s18 = ssub.s32 %s1026_s15, %s1182_s17  ;;  %162 = sbr.rel (%p755_p5) target bundleno = 20 (0x14), region = 20 }
   0x8   : > { %p39_p4 = scmp.eq.s32.totalorder %s37_s18, 0 }
   0xa   : > { %s1088_s20 = scalar_select %p39_p4, %s1018_s13, %s41_s19  }
   0xc   : > { %165 = sbr.rel (!%p50_p3) target bundleno = 20 (0x14), region = 24  ;;  %s167_s21 = sand.u32 (%p50_p3), 1, %s1018_s13  }
   0xd   : > { %s913_s22 = sshll.u32 (%p50_p3), %s1026_s15, 4  ;;  %s756_s23 = sshll.u32 (%p50_p3), %s167_s21, 5 }
   0xe   : > { %s175_s26 = scalar_lea.vmem (%p50_p3), %s1173_s0, %s913_s22  ;;  %s169_s27 = scalar_lea.vmem (%p50_p3), [#allocation3], %s756_s23 }
   0xf   : > { %v188_v0 = vld [vmem:[%s175_s26] sm:$0xff] (%p50_p3)  ;;  %v190_v1 = vld [vmem:[%s175_s26 + $0x8] sm:$0xff] (%p50_p3) }
  0x10   : > { %v192_v2 = vld [vmem:[%s175_s26 + $0x20] sm:$0xff] (%p50_p3)  ;;  %189 = vst [vmem:[%s169_s27] sm:$0xff] (%p50_p3), %v188_v0  ;;  %v194_v3 = vld [vmem:[%s175_s26 + $0x28] sm:$0xff] (%p50_p3) }
  0x11   : > { %191 = vst [vmem:[%s169_s27 + $0x8] sm:$0xff] %v190_v1 }
  0x12   : > { %193 = vst [vmem:[%s169_s27 + $0x10] sm:$0xff] %v192_v2 }
  0x13   : > { %195 = vst [vmem:[%s169_s27 + $0x18] sm:$0xff] %v194_v3 }
  0x14 PF: > { %p759_p6 = scmp.ge.s32.totalorder %s1030_s16, 1  ;;  %p212_p7 = scmp.lt.s32.totalorder %s1030_s16, 3 }
  0x16   : > { %p213_p8 = pnand %p759_p6, %p212_p7 }
  0x17   : > { %s219_s28 = sand.u32 (!%p213_p8), 1, %s1014_s12   ;;  %s761_s29 = sshll.u32 (!%p213_p8), %s1022_s14, 6 }
  0x18   : > { %216 = sbr.rel (%p213_p8) target bundleno = 228 (0xe4), region = 51  ;;  %s760_s30 = sshll.u32 (!%p213_p8), %s219_s28, 5 }
  0x19   : > { %p259_p9 = scmp.lt.s32.totalorder (!%p213_p8), %s761_s29, 127  ;;  %s1105_s8 = scalar_lea.vmem (!%p213_p8), [#allocation3], %s760_s30 }
  0x1a   : > { %p763_p10 = scmp.ne.s32.totalorder (!%p213_p8), %s1022_s14, 0 }
  0x1d   : > { %s1184_s29 = smov (!%p259_p9, %s761_s29), 127  ;;  %282 = sbr.rel (%p763_p10) target bundleno = 37 (0x25), region = 59 }
  0x1e   : > { %s762_s4 = sshll.u32 %s1184_s29, 2 }
  0x1f   : > { %s1103_s7 = scalar_lea.vmem %s1174_s1, %s762_s4 }
  0x22   : > { %v1032_v4 = vmov 0.0  }
  0x23   : > { %283 = vst [vmem:[#allocation2] sm:$0xff] %v1032_v4 }
  0x24   : > { %284 = vst [vmem:[#allocation2 + $0x8] sm:$0xff] %v1032_v4 }
  0x25 PF: > { %v925_v5 = vld [vmem:[%s1103_s7 + $0x38] sm:$0xff]  ;;  %v924_v9 = vld [vmem:[%s1103_s7 + $0x30] sm:$0xff]  ;;  %v923_v13 = vld [vmem:[%s1103_s7 + $0x28] sm:$0xff]  ;;  %p908_p11 = scmp.ne.s32.totalorder %s1022_s14, 1 }
  0x26   : > { %v933_v6 = vld [vmem:[%s1103_s7 + $0x78] sm:$0xff]  ;;  %567 = vmatpush.bf16.msra.mxu0 %v925_v5  ;;  %v932_v10 = vld [vmem:[%s1103_s7 + $0x70] sm:$0xff]  ;;  %v931_v14 = vld [vmem:[%s1103_s7 + $0x68] sm:$0xff] }
  0x27   : > { %v941_v7 = vld [vmem:[%s1103_s7 + $0xb8] sm:$0xff]  ;;  %581 = vmatpush.bf16.msra.mxu1 %v933_v6  ;;  %v940_v11 = vld [vmem:[%s1103_s7 + $0xb0] sm:$0xff]  ;;  %v939_v15 = vld [vmem:[%s1103_s7 + $0xa8] sm:$0xff] }
  0x28   : > { %v949_v8 = vld [vmem:[%s1103_s7 + $0xf8] sm:$0xff]  ;;  %595 = vmatpush.bf16.msra.mxu2 %v941_v7  ;;  %v948_v12 = vld [vmem:[%s1103_s7 + $0xf0] sm:$0xff]  ;;  %v947_v16 = vld [vmem:[%s1103_s7 + $0xe8] sm:$0xff] }
  0x29   : > { %609 = vmatpush.bf16.msra.mxu3 %v949_v8  ;;  %v922_v17 = vld [vmem:[%s1103_s7 + $0x20] sm:$0xff]  ;;  %v921_v21 = vld [vmem:[%s1103_s7 + $0x18] sm:$0xff]  ;;  %v920_v25 = vld [vmem:[%s1103_s7 + $0x10] sm:$0xff] }
  0x2a   : > { %568 = vmatpush.bf16.msra.mxu0 %v924_v9  ;;  %v930_v18 = vld [vmem:[%s1103_s7 + $0x60] sm:$0xff]  ;;  %v929_v22 = vld [vmem:[%s1103_s7 + $0x58] sm:$0xff]  ;;  %v928_v26 = vld [vmem:[%s1103_s7 + $0x50] sm:$0xff] }
  0x2b   : > { %582 = vmatpush.bf16.msra.mxu1 %v932_v10  ;;  %v938_v19 = vld [vmem:[%s1103_s7 + $0xa0] sm:$0xff]  ;;  %v937_v23 = vld [vmem:[%s1103_s7 + $0x98] sm:$0xff]  ;;  %v936_v27 = vld [vmem:[%s1103_s7 + $0x90] sm:$0xff] }
  0x2c   : > { %596 = vmatpush.bf16.msra.mxu2 %v940_v11  ;;  %v946_v20 = vld [vmem:[%s1103_s7 + $0xe0] sm:$0xff]  ;;  %v945_v24 = vld [vmem:[%s1103_s7 + $0xd8] sm:$0xff]  ;;  %v944_v28 = vld [vmem:[%s1103_s7 + $0xd0] sm:$0xff] }
  0x2d   : > { %610 = vmatpush.bf16.msra.mxu3 %v948_v12  ;;  %v919_v29 = vld [vmem:[%s1103_s7 + $0x8] sm:$0xff]  ;;  %v918_v33 = vld [vmem:[%s1103_s7] sm:$0xff]  ;;  %v766_v37 = vld [vmem:[%s1105_s8] sm:$0xf] }
  0x2e   : > { %569 = vmatpush.bf16.msra.mxu0 %v923_v13  ;;  %v927_v30 = vld [vmem:[%s1103_s7 + $0x48] sm:$0xff]  ;;  %v926_v34 = vld [vmem:[%s1103_s7 + $0x40] sm:$0xff]  ;;  %v914_v39 = vld [vmem:[%s1105_s8 + $0x4] sm:$0xf] }
  0x2f   : > { %583 = vmatpush.bf16.msra.mxu1 %v931_v14  ;;  %v935_v31 = vld [vmem:[%s1103_s7 + $0x88] sm:$0xff]  ;;  %v934_v35 = vld [vmem:[%s1103_s7 + $0x80] sm:$0xff]  ;;  %v774_v41 = vld [vmem:[%s1105_s8 + $0x8] sm:$0xf] }
  0x30   : > { %597 = vmatpush.bf16.msra.mxu2 %v939_v15  ;;  %v943_v32 = vld [vmem:[%s1103_s7 + $0xc8] sm:$0xff]  ;;  %v942_v36 = vld [vmem:[%s1103_s7 + $0xc0] sm:$0xff]  ;;  %v915_v43 = vld [vmem:[%s1105_s8 + $0xc] sm:$0xf] }
  0x31   : > { %611 = vmatpush.bf16.msra.mxu3 %v947_v16  ;;  %v916_v38 = vld [vmem:[%s1105_s8 + $0xc] sm:$0xf0]  ;;  %v768_v40 = vld [vmem:[%s1105_s8 + $0x10] sm:$0xf0]  ;;  %v917_v42 = vld [vmem:[%s1105_s8 + $0x14] sm:$0xf0] }
  0x32   : > { %570 = vmatpush.bf16.msra.mxu0 %v922_v17  ;;  %v776_v44 = vld [vmem:[%s1105_s8 + $0x18] sm:$0xf0]  ;;  %v767_v45 = vor.u32 %v916_v38, %v766_v37  ;;  %v771_v46 = vor.u32 %v914_v39, %v768_v40  ;;  %v775_v47 = vor.u32 %v917_v42, %v774_v41  ;;  %v285_v55 = vld [vmem:[#allocation2] sm:$0xff] }
  0x33   : > { %584 = vmatpush.bf16.msra.mxu1 %v930_v18  ;;  %v779_v48 = vor.u32 %v915_v43, %v776_v44  ;;  %v286_v63 = vld [vmem:[#allocation2 + $0x8] sm:$0xff] }
  0x34   : > { %598 = vmatpush.bf16.msra.mxu2 %v938_v19 }
  0x35   : > { %612 = vmatpush.bf16.msra.mxu3 %v946_v20 }
  0x36   : > { %571 = vmatpush.bf16.msra.mxu0 %v921_v21 }
  0x37   : > { %585 = vmatpush.bf16.msra.mxu1 %v929_v22 }
  0x38   : > { %599 = vmatpush.bf16.msra.mxu2 %v937_v23 }
  0x39   : > { %613 = vmatpush.bf16.msra.mxu3 %v945_v24 }
  0x3a   : > { %572 = vmatpush.bf16.msra.mxu0 %v920_v25 }
  0x3b   : > { %586 = vmatpush.bf16.msra.mxu1 %v928_v26 }
  0x3c   : > { %600 = vmatpush.bf16.msra.mxu2 %v936_v27 }
  0x3d   : > { %614 = vmatpush.bf16.msra.mxu3 %v944_v28 }
  0x3e   : > { %573 = vmatpush.bf16.msra.mxu0 %v919_v29 }
  0x3f   : > { %587 = vmatpush.bf16.msra.mxu1 %v927_v30 }
  0x40   : > { %601 = vmatpush.bf16.msra.mxu2 %v935_v31 }
  0x41   : > { %615 = vmatpush.bf16.msra.mxu3 %v943_v32 }
  0x42   : > { %574 = vmatpush.bf16.msra.mxu0 %v918_v33 }
  0x43   : > { %588 = vmatpush.bf16.msra.mxu1 %v926_v34 }
  0x44   : > { %602 = vmatpush.bf16.msra.mxu2 %v934_v35 }
  0x45   : > { %616 = vmatpush.bf16.msra.mxu3 %v942_v36  ;;  %575 = vmatmul.bf16.vlgmr.msra.gmra.mxu0 %v767_v45 }
  0x46   : > { %589 = vmatmul.bf16.vlgmr.msra.gmra.mxu1 %v771_v46 }
  0x47   : > { %603 = vmatmul.bf16.vlgmr.msra.gmra.mxu2 %v775_v47 }
  0x48   : > { %617 = vmatmul.bf16.vlgmr.msra.gmra.mxu3 %v779_v48 }
  0xc2   : > { %v576_v49 = vpop.f32.mrf.mxu0 }
  0xc3   : > { %v590_v50 = vpop.f32.mrf.mxu1 }
  0xc4   : > { %v591_v51 = vadd.f32 %v590_v50, %v576_v49 }
  0xca   : > { %v604_v52 = vpop.f32.mrf.mxu2  ;;  %v578_v57 = vpop.f32.mrf.mxu0 }
  0xcb   : > { %v618_v53 = vpop.f32.mrf.mxu3  ;;  %v605_v54 = vadd.f32 %v604_v52, %v591_v51  ;;  %v592_v58 = vpop.f32.mrf.mxu1 }
  0xcc   : > { %v593_v60 = vadd.f32 %v592_v58, %v578_v57 }
  0xcd   : > { %v619_v56 = vadd.f32 %v618_v53, %v605_v54 }
  0xcf   : > { %v623_v59 = vadd.f32 %v619_v56, %v285_v55 }
  0xd1   : > { %625 = vst [vmem:[#allocation2] sm:$0xff] %v623_v59 }
  0xd2   : > { %v606_v61 = vpop.f32.mrf.mxu2 }
  0xd3   : > { %v607_v62 = vadd.f32 %v606_v61, %v593_v60  ;;  %v620_v0 = vpop.f32.mrf.mxu3 }
  0xd5   : > { %v621_v1 = vadd.f32 %v620_v0, %v607_v62  ;;  %630 = sbr.rel (%p908_p11) target bundleno = 228 (0xe4), region = 63 }
  0xd7   : > { %v624_v2 = vadd.f32 %v621_v1, %v286_v63 }
  0xd9   : > { %626 = vst [vmem:[#allocation2 + $0x8] sm:$0xff] %v624_v2 }
  0xda   : > { %v631_v3 = vld [vmem:[#allocation2] sm:$0xff] }
  0xdb   : > { %v991_v4 = vld [vmem:[%s1175_s2] ss:$0 sm:$0xff] }
  0xdc   : > { %v637_v6 = vadd.f32 %v991_v4, %v631_v3 }
  0xde   : > { %639 = vst [vmem:[%s1176_s3] sm:$0xff] %v637_v6 }
  0xe0   : > { %v632_v5 = vld [vmem:[#allocation2 + $0x8] sm:$0xff] }
  0xe1   : > { %v638_v7 = vadd.f32 %v991_v4, %v632_v5 }
  0xe3   : > { %640 = vst [vmem:[%s1176_s3 + $0x8] sm:$0xff] %v638_v7 }
  0xe4 PF: > { %s13_s16 = sadd.s32 1, %s1030_s16   ;;  %s1177_s12 = smov %s1018_s13 }
  0xe5   : > { %p10_p12 = scmp.ge.s32.totalorder %s13_s16, 4   ;;  %s1178_s13 = smov %s1088_s20 }
  0xe6   : > { %s1179_s14 = smov %s1026_s15  ;;  %s1180_s15 = smov %s1182_s17 }
  0xe7   :  { %12 = sbr.rel (!%p10_p12) target bundleno = 3 (0x3), region = 104 }

</bundles_post_ra>
